<compile_context>
chip_gen: v7x
topology: tpu7x:2x2x1
jax: 0.10.0
libtpu: 0.0.40
codegen_flags: <defaults>
</compile_context>

<pallas_src>
import math
from functools import lru_cache, partial

import numpy as np
import jax
import jax.numpy as jnp
from jax.experimental import pallas as pl
from jax.experimental.pallas import tpu as pltpu


# ----------------------------------------------------------------------------
# small helpers
# ----------------------------------------------------------------------------
def _round_up(x, m):
    return ((x + m - 1) // m) * m


def _cdiv(a, b):
    return (a + b - 1) // b


@lru_cache(maxsize=1)
def _vmem_budgets():
    """Generation-aware VMEM budgeting: (tile budget, vmem_limit_bytes)."""
    cap = 64 * 1024 * 1024
    try:  # hardware query; fall back to v7x-safe numbers if unavailable
        cap = int(pltpu.get_tpu_info().vmem_capacity_bytes)
    except Exception:
        pass
    if cap >= 128 * 1024 * 1024:                    # v5e / v6e (128 MiB VMEM)
        return 48 * 1024 * 1024, 64 * 1024 * 1024
    return 24 * 1024 * 1024, 32 * 1024 * 1024       # v7x (64 MiB / TensorCore)


def _const_spec(shape, index_map, use_buffered):
    """BlockSpec for a grid-invariant (resident) operand.

    A second pipeline buffer for a constant-index block is pure VMEM waste, so
    request single buffering when supported (perf review item #2)."""
    if use_buffered:
        try:
            return pl.BlockSpec(shape, index_map, pipeline_mode=pl.Buffered(1))
        except Exception:  # older jax without pipeline_mode / Buffered
            pass
    return pl.BlockSpec(shape, index_map)


def _choose_tm(mw, tm_min, tm_cap, n):
    """Pick the pixel-tile (lane) size and padded output-column count.

    Prefers tiles that exactly divide round_up(mw, 128): no dead GEMM columns
    and no tm-sized output padding.  When N == 1 also prefers >= 2 tiles so
    both v7x TensorCores get work.  tm_min/tm_cap are multiples of 128."""
    mw128 = _round_up(mw, 128)
    q = mw128 // 128
    divisors = [128 * t for t in range(1, q + 1) if q % t == 0]

    def pick(cands):
        cands = [t for t in cands if tm_min <= t <= tm_cap]
        return max(cands) if cands else 0

    tm = pick([t for t in divisors if mw128 // t >= 2]) if n == 1 else 0
    if not tm:
        tm = pick(divisors)
    if tm and (tm >= 512 or mw128 // tm <= 8):
        return tm, mw128
    # No good exact divisor: use the largest fitting tile and pad the output
    # columns (they are sliced back to the true pixel count on the XLA side).
    want = mw128 if n > 1 else _round_up(_cdiv(mw128, 2), 128)
    tm = min(tm_cap, max(tm_min, want))
    return tm, _round_up(mw128, tm)


def _pick_halo(tm, d_halo):
    """Smallest multiple of 128 that divides tm and covers the max shift."""
    for h in range(128, tm + 1, 128):
        if tm % h == 0 and h >= d_halo:
            return h
    return tm


def _plan_fused(*, n, c, o, k, wp, ho, budget, out_itemsize):
    """Tile plan for the fused-im2col (stride-1) path, or None -> fallback."""
    kk = k * k
    mw = ho * wp                                  # "wide" pixels (row pitch Wp)
    d_halo = (k - 1) * (wp + 1)                   # largest flattened shift
    tm_min = max(128, _round_up(d_halo, 128))

    fixed = kk * o * c * 2 + o * 128 * 4          # resident bf16 W + f32 bias

    def fits(tm):
        per_col = (4 * c * 2            # current + halo blocks, 2 buffers, bf16
                   + 3 * c * 2          # concat + shifted-window temporaries
                   + 2 * o * out_itemsize   # double-buffered output tile
                   + o * 4)             # f32 accumulator value
        return fixed + tm * per_col <= budget

    tm_cap = 2048
    while tm_cap > 128 and not fits(tm_cap):
        tm_cap //= 2
    if not fits(tm_cap) or tm_min > tm_cap:
        return None                               # would not fit VMEM
    # TODO(synk): for very deep layers add a C-reduction grid axis ("arbitrary")
    # with a f32 VMEM accumulator instead of shrinking TM.
    return _choose_tm(mw, tm_min, tm_cap, n)


def _fallback_tm_cap(kd, o, budget, out_itemsize):
    fixed = o * kd * 2 + o * 128 * 4              # resident bf16 W + f32 bias
    def fits(tm):
        return fixed + tm * (2 * kd * 2 + 2 * o * out_itemsize) <= budget
    tm = 2048
    while tm > 128 and not fits(tm):
        tm //= 2
    return tm


# ----------------------------------------------------------------------------
# Pallas kernels
# ----------------------------------------------------------------------------
def _make_fused_kernel(k, wp, tm):
    kk = k * k

    def kernel(xc_ref, xn_ref, w_ref, b_ref, o_ref):
        # xc_ref: (1, C, TM)   bf16  flattened padded input, current block
        # xn_ref: (1, C, TH)   bf16  right halo (TH >= max shift, 128-aligned)
        # w_ref : (K*K, O, C)  bf16  masked weight, one (O, C) slab per tap
        # b_ref : (O, 1)       f32   bias column (broadcast over lanes)
        # o_ref : (1, O, TM)         lane-dense output tile
        xx = jnp.concatenate([xc_ref[0], xn_ref[0]], axis=-1)  # 128-aligned cat
        acc = None
        for t in range(kk):
            d = (t // k) * wp + (t % k)                 # static flattened shift
            win = xc_ref[0] if d == 0 else xx[:, d:d + tm]
            part = jnp.dot(w_ref[t], win, preferred_element_type=jnp.float32)
            acc = part if acc is None else acc + part
        o_ref[0] = (acc + b_ref[...]).astype(o_ref.dtype)

    return kernel


def _masked_conv_gemm_kernel(p_ref, w_ref, b_ref, o_ref):
    # p_ref: (1, Kd, TM) bf16 im2col patch tile; w_ref: (O, Kd) bf16 resident.
    acc = jnp.dot(w_ref[...], p_ref[0], preferred_element_type=jnp.float32)
    o_ref[0] = (acc + b_ref[...]).astype(o_ref.dtype)


# ----------------------------------------------------------------------------
# pallas_call wrappers
# ----------------------------------------------------------------------------
def _pallas_fused_conv(x_flat, w_flat, bias_col, *, k, wp, tm, tm_halo, mw_out,
                       out_dtype, use_buffered, vmem_limit):
    n, c, _ = x_flat.shape
    kk, o, _ = w_flat.shape
    nt = mw_out // tm
    halo_ratio = tm // tm_halo

    flops = 2 * n * mw_out * kk * o * c
    bytes_accessed = int(x_flat.size * 2 + w_flat.size * 2 + o * 4
                         + n * o * mw_out * np.dtype(out_dtype).itemsize)

    return pl.pallas_call(
        _make_fused_kernel(k, wp, tm),
        out_shape=jax.ShapeDtypeStruct((n, o, mw_out), out_dtype),
        grid=(n, nt),
        in_specs=[
            pl.BlockSpec((1, c, tm), lambda i, m: (i, 0, m)),
            # right halo of the same array (covers shifts up to (K-1)*(Wp+1))
            pl.BlockSpec((1, c, tm_halo),
                         lambda i, m: (i, 0, (m + 1) * halo_ratio)),
            _const_spec((kk, o, c), lambda i, m: (0, 0, 0), use_buffered),
            _const_spec((o, 1), lambda i, m: (0, 0), use_buffered),
        ],
        out_specs=pl.BlockSpec((1, o, tm), lambda i, m: (i, 0, m)),
        compiler_params=pltpu.CompilerParams(
            dimension_semantics=("parallel", "parallel"),   # megacore on v7x
            vmem_limit_bytes=vmem_limit),
        cost_estimate=pl.CostEstimate(flops=flops, transcendentals=0,
                                      bytes_accessed=bytes_accessed),
    )(x_flat, x_flat, w_flat, bias_col)


def _pallas_masked_conv_gemm(patches, w_mat, bias_col, *, tm, out_dtype,
                             use_buffered, vmem_limit):
    n, kd, mp = patches.shape
    o = w_mat.shape[0]
    flops = 2 * n * mp * kd * o
    bytes_accessed = int(patches.size * 2 + w_mat.size * 2 + o * 4
                         + n * o * mp * np.dtype(out_dtype).itemsize)
    return pl.pallas_call(
        _masked_conv_gemm_kernel,
        out_shape=jax.ShapeDtypeStruct((n, o, mp), out_dtype),
        grid=(n, mp // tm),
        in_specs=[
            pl.BlockSpec((1, kd, tm), lambda i, m: (i, 0, m)),
            _const_spec((o, kd), lambda i, m: (0, 0), use_buffered),
            _const_spec((o, 1), lambda i, m: (0, 0), use_buffered),
        ],
        out_specs=pl.BlockSpec((1, o, tm), lambda i, m: (i, 0, m)),
        compiler_params=pltpu.CompilerParams(
            dimension_semantics=("parallel", "parallel"),
            vmem_limit_bytes=vmem_limit),
        cost_estimate=pl.CostEstimate(flops=flops, transcendentals=0,
                                      bytes_accessed=bytes_accessed),
    )(patches, w_mat, bias_col)


# ----------------------------------------------------------------------------
# jitted forward glue
# ----------------------------------------------------------------------------
@partial(jax.jit, static_argnames=("kernel_size", "stride", "padding", "budget",
                                   "vmem_limit", "use_buffered", "out_dtype"))
def _masked_conv2d_forward(x, weight, bias, mask, *, kernel_size, stride,
                           padding, budget, vmem_limit, use_buffered,
                           out_dtype):
    n, c, h, w = x.shape
    o = weight.shape[0]
    k, s, p = kernel_size, stride, padding
    hp, wp = h + 2 * p, w + 2 * p
    ho = (hp - k) // s + 1
    wo = (wp - k) // s + 1
    out_itemsize = np.dtype(out_dtype).itemsize

    # Tiny hoisted prep (exactly what the PyTorch module does to its weight).
    w_masked = (weight * mask[:, None, None, None]).astype(jnp.bfloat16)
    bias_col = bias.reshape(o, 1).astype(jnp.float32)
    x_b = x.astype(jnp.bfloat16)

    plan = None
    if s == 1:
        plan = _plan_fused(n=n, c=c, o=o, k=k, wp=wp, ho=ho,
                           budget=budget, out_itemsize=out_itemsize)

    if plan is not None:
        # ---------- fused-im2col path (stride 1): no patch tensor in HBM ----
        tm, mw_out = plan
        d_halo = (k - 1) * (wp + 1)
        tm_halo = _pick_halo(tm, d_halo)
        nt = mw_out // tm
        lp = hp * wp
        lp_pad = nt * tm + tm_halo        # every referenced block in-bounds
        x_pad = jnp.pad(x_b, ((0, 0), (0, 0), (p, p), (p, p)))
        x_flat = x_pad.reshape(n, c, lp)
        x_flat = jnp.pad(x_flat, ((0, 0), (0, 0), (0, lp_pad - lp)))
        # (K*K, O, C) with tap index kh*K + kw, matching shift kh*Wp + kw.
        w_flat = jnp.transpose(w_masked, (2, 3, 0, 1)).reshape(k * k, o, c)
        out_wide = _pallas_fused_conv(
            x_flat, w_flat, bias_col, k=k, wp=wp, tm=tm, tm_halo=tm_halo,
            mw_out=mw_out, out_dtype=out_dtype, use_buffered=use_buffered,
            vmem_limit=vmem_limit)
        # Drop the (K-1) garbage columns per row pitch and the column padding.
        out = out_wide[:, :, :ho * wp].reshape(n, o, ho, wp)[:, :, :, :wo]
        return out

    # ---------- generic fallback (stride != 1 / halo > VMEM): XLA im2col ----
    # TODO(synk): fuse im2col for strided convs too (per-phase column split).
    kd = c * k * k
    m_hw = ho * wo
    tm_cap = _fallback_tm_cap(kd, o, budget, out_itemsize)
    tm, m_out = _choose_tm(m_hw, 128, tm_cap, n)
    x_pad = jnp.pad(x_b, ((0, 0), (0, 0), (p, p), (p, p)))
    taps = []
    for kh in range(k):
        for kw in range(k):
            taps.append(x_pad[:, :, kh:kh + (ho - 1) * s + 1:s,
                                    kw:kw + (wo - 1) * s + 1:s])
    patches = jnp.stack(taps, axis=2).reshape(n, kd, m_hw)
    if m_out != m_hw:
        patches = jnp.pad(patches, ((0, 0), (0, 0), (0, m_out - m_hw)))
    out = _pallas_masked_conv_gemm(
        patches, w_masked.reshape(o, kd), bias_col, tm=tm, out_dtype=out_dtype,
        use_buffered=use_buffered, vmem_limit=vmem_limit)
    return out[:, :, :m_hw].reshape(n, o, ho, wo)


_BUFFERED_OK = True


def _run_forward(x, weight, bias, mask, **kwargs):
    """Run the jitted forward; if single-buffered (pl.Buffered(1)) resident
    specs are rejected by this jax/Mosaic version, retry with defaults."""
    global _BUFFERED_OK
    if _BUFFERED_OK:
        try:
            return _masked_conv2d_forward(x, weight, bias, mask,
                                          use_buffered=True, **kwargs)
        except Exception:
            _BUFFERED_OK = False
    return _masked_conv2d_forward(x, weight, bias, mask,
                                  use_buffered=False, **kwargs)


# ----------------------------------------------------------------------------
# Module-equivalent wrapper
# ----------------------------------------------------------------------------
class SoftMaskedConv2dPallas:
    """JAX/Pallas forward-pass equivalent of the PyTorch SoftMaskedConv2d."""

    def __init__(self, in_channels, out_channels, kernel_size, stride=1,
                 padding=0, bias=True, key=None):
        if key is None:
            key = jax.random.PRNGKey(0)
        self.in_channels = in_channels
        self.out_channels = out_channels
        self.kernel_size = kernel_size
        self.stride = stride
        self.padding = padding
        self.gumbel_temperature = 1.0
        self.feature_map_h = 0
        self.feature_map_w = 0

        k_w, k_b, k_m = jax.random.split(key, 3)
        fan_in = in_channels * kernel_size * kernel_size
        bound_w = math.sqrt(1.0 / fan_in)       # kaiming_uniform_(a=sqrt(5))
        self.weight = jax.random.uniform(
            k_w, (out_channels, in_channels, kernel_size, kernel_size),
            minval=-bound_w, maxval=bound_w, dtype=jnp.float32)
        if bias:
            bound_b = 1.0 / math.sqrt(fan_in)
            self.bias = jax.random.uniform(
                k_b, (out_channels,), minval=-bound_b, maxval=bound_b,
                dtype=jnp.float32)
        else:
            self.bias = jnp.zeros((out_channels,), jnp.float32)
        # kaiming_normal_ on (O, 2, 1, 1): fan_in = 2, gain = sqrt(2) -> std=1
        self.mask_weight = jax.random.normal(
            k_m, (out_channels, 2, 1, 1), dtype=jnp.float32)

    def update_gumbel_temperature(self, gumbel_temperature):
        self.gumbel_temperature = gumbel_temperature

    def compute_mask(self, ticket, gumbel_temperature, rng_key):
        # TODO(synk): forward value only; the straight-through Gumbel-softmax
        # gradient of the PyTorch module is not reproduced (custom_vjp needed).
        logits = self.mask_weight[:, :, 0, 0]                        # (O, 2)
        if ticket:
            return jnp.argmax(logits, axis=1).astype(jnp.float32)    # (O,)
        g = jax.random.gumbel(rng_key, logits.shape, dtype=jnp.float32)
        y_soft = jax.nn.softmax((logits + g) / gumbel_temperature, axis=1)
        hard = jax.nn.one_hot(jnp.argmax(y_soft, axis=1), 2, dtype=jnp.float32)
        return hard[:, 1]                                            # (O,)

    def forward(self, x, ticket=False, gumbel_temperature=None,
                rng_key=None, out_dtype=jnp.float32):
        if rng_key is None:
            rng_key = jax.random.PRNGKey(1)
        gumbel_temp = (gumbel_temperature if gumbel_temperature is not None
                       else self.gumbel_temperature)
        mask = self.compute_mask(ticket, gumbel_temp, rng_key)       # (O,)
        budget, vmem_limit = _vmem_budgets()
        out = _run_forward(
            x, self.weight, self.bias, mask,
            kernel_size=self.kernel_size, stride=self.stride,
            padding=self.padding, budget=budget, vmem_limit=vmem_limit,
            out_dtype=out_dtype)
        self.feature_map_h, self.feature_map_w = out.shape[2], out.shape[3]
        return out

    __call__ = forward


# ----------------------------------------------------------------------------
if __name__ == "__main__":
    key = jax.random.PRNGKey(0)
    k_x, k_mod = jax.random.split(key)

    N, C, H, W = 2, 4, 16, 16
    O, K, S, P = 8, 3, 1, 1

    x = jax.random.normal(k_x, (N, C, H, W), dtype=jnp.float32)
    mod = SoftMaskedConv2dPallas(C, O, K, stride=S, padding=P, bias=True,
                                 key=k_mod)

    # ticket=True path (deterministic argmax mask) -> fused stride-1 kernel
    out = jax.block_until_ready(mod.forward(x, ticket=True))
    assert out.shape == (N, O, H, W)

    # sanity check vs. XLA conv on the same bf16-cast inputs (f32 accumulation)
    mask = mod.compute_mask(True, 1.0, jax.random.PRNGKey(1))
    masked_w = (mod.weight * mask[:, None, None, None]).astype(jnp.bfloat16)
    ref = jax.lax.conv_general_dilated(
        x.astype(jnp.bfloat16), masked_w,
        window_strides=(S, S), padding=[(P, P), (P, P)],
        dimension_numbers=("NCHW", "OIHW", "NCHW"),
        preferred_element_type=jnp.float32) + mod.bias[None, :, None, None]
    err = float(jnp.max(jnp.abs(out - ref)))
    assert jnp.allclose(out, ref, atol=5e-2, rtol=5e-2), err

    # gumbel (non-ticket) path also exercises the fused kernel
    out_g = jax.block_until_ready(
        mod.forward(x, ticket=False, gumbel_temperature=0.5,
                    rng_key=jax.random.PRNGKey(2)))
    assert out_g.shape == (N, O, H, W)

    # stride-2 exercises the generic im2col fallback path
    mod2 = SoftMaskedConv2dPallas(C, O, K, stride=2, padding=P, bias=True,
                                  key=k_mod)
    out2 = jax.block_until_ready(mod2.forward(x, ticket=True))
    mask2 = mod2.compute_mask(True, 1.0, jax.random.PRNGKey(1))
    ref2 = jax.lax.conv_general_dilated(
        x.astype(jnp.bfloat16),
        (mod2.weight * mask2[:, None, None, None]).astype(jnp.bfloat16),
        window_strides=(2, 2), padding=[(P, P), (P, P)],
        dimension_numbers=("NCHW", "OIHW", "NCHW"),
        preferred_element_type=jnp.float32) + mod2.bias[None, :, None, None]
    assert out2.shape == ref2.shape
    err2 = float(jnp.max(jnp.abs(out2 - ref2)))
    assert jnp.allclose(out2, ref2, atol=5e-2, rtol=5e-2), err2

    print("KERNEL_OK")
</pallas_src>

<mosaic_0001>
module attributes {stable_mosaic.version = 11 : i64} {
  func.func @kernel(%arg0: i32, %arg1: i32, %arg2: memref<1x4x384xbf16, #tpu.memory_space<vmem>>, %arg3: memref<1x4x128xbf16, #tpu.memory_space<vmem>>, %arg4: memref<9x8x4xbf16, #tpu.memory_space<vmem>>, %arg5: memref<8x1xf32, #tpu.memory_space<vmem>>, %arg6: memref<1x8x384xf32, #tpu.memory_space<vmem>>) attributes {dimension_semantics = [#tpu.dimension_semantics<parallel>, #tpu.dimension_semantics<parallel>], iteration_bounds = array<i64: 2, 1>, scalar_prefetch = 0 : i64, scratch_operands = 0 : i64, tpu.core_type = #tpu.core_type<tc>, window_params = [{transform_indices = @transform_0, window_bounds = array<i64: 1, 4, 384>}, {transform_indices = @transform_1, window_bounds = array<i64: 1, 4, 128>}, {pipeline_mode = #tpu.pipeline_mode<synchronous>, transform_indices = @transform_2, window_bounds = array<i64: 9, 8, 4>}, {pipeline_mode = #tpu.pipeline_mode<synchronous>, transform_indices = @transform_3, window_bounds = array<i64: 8, 1>}, {transform_indices = @transform_4, window_bounds = array<i64: 1, 8, 384>}]} {
    %c0 = arith.constant 0 : index
    %c0_0 = arith.constant 0 : index
    %c0_1 = arith.constant 0 : index
    %0 = vector.load %arg2[%c0, %c0_0, %c0_1] : memref<1x4x384xbf16, #tpu.memory_space<vmem>>, vector<1x4x384xbf16>
    %1 = vector.shape_cast %0 : vector<1x4x384xbf16> to vector<4x384xbf16>
    %c0_2 = arith.constant 0 : index
    %c0_3 = arith.constant 0 : index
    %c0_4 = arith.constant 0 : index
    %2 = vector.load %arg3[%c0_2, %c0_3, %c0_4] : memref<1x4x128xbf16, #tpu.memory_space<vmem>>, vector<1x4x128xbf16>
    %3 = vector.shape_cast %2 : vector<1x4x128xbf16> to vector<4x128xbf16>
    %4 = tpu.concatenate %1, %3 in 1 : vector<4x384xbf16>, vector<4x128xbf16> -> vector<4x512xbf16>
    %c0_5 = arith.constant 0 : index
    %c0_6 = arith.constant 0 : index
    %c0_7 = arith.constant 0 : index
    %5 = vector.load %arg2[%c0_5, %c0_6, %c0_7] : memref<1x4x384xbf16, #tpu.memory_space<vmem>>, vector<1x4x384xbf16>
    %6 = vector.shape_cast %5 : vector<1x4x384xbf16> to vector<4x384xbf16>
    %c0_8 = arith.constant 0 : index
    %c0_9 = arith.constant 0 : index
    %c0_10 = arith.constant 0 : index
    %7 = vector.load %arg4[%c0_8, %c0_9, %c0_10] : memref<9x8x4xbf16, #tpu.memory_space<vmem>>, vector<1x8x4xbf16>
    %8 = vector.shape_cast %7 : vector<1x8x4xbf16> to vector<8x4xbf16>
    %cst = arith.constant dense<0.000000e+00> : vector<8x384xf32>
    %9 = tpu.matmul %8, %6, %cst {dimension_numbers = #tpu.dot_dimension_numbers<[1], [0], [0], [1], [0, 0, 1, 1], [], []>} : vector<8x4xbf16>, vector<4x384xbf16>, vector<8x384xf32> -> vector<8x384xf32>
    %10 = vector.extract_strided_slice %4 {offsets = [0, 1], sizes = [4, 384], strides = [1, 1]} : vector<4x512xbf16> to vector<4x384xbf16>
    %c1 = arith.constant 1 : index
    %c0_11 = arith.constant 0 : index
    %c0_12 = arith.constant 0 : index
    %11 = vector.load %arg4[%c1, %c0_11, %c0_12] : memref<9x8x4xbf16, #tpu.memory_space<vmem>>, vector<1x8x4xbf16>
    %12 = vector.shape_cast %11 : vector<1x8x4xbf16> to vector<8x4xbf16>
    %cst_13 = arith.constant dense<0.000000e+00> : vector<8x384xf32>
    %13 = tpu.matmul %12, %10, %cst_13 {dimension_numbers = #tpu.dot_dimension_numbers<[1], [0], [0], [1], [0, 0, 1, 1], [], []>} : vector<8x4xbf16>, vector<4x384xbf16>, vector<8x384xf32> -> vector<8x384xf32>
    %14 = arith.addf %9, %13 : vector<8x384xf32>
    %15 = vector.extract_strided_slice %4 {offsets = [0, 2], sizes = [4, 384], strides = [1, 1]} : vector<4x512xbf16> to vector<4x384xbf16>
    %c2 = arith.constant 2 : index
    %c0_14 = arith.constant 0 : index
    %c0_15 = arith.constant 0 : index
    %16 = vector.load %arg4[%c2, %c0_14, %c0_15] : memref<9x8x4xbf16, #tpu.memory_space<vmem>>, vector<1x8x4xbf16>
    %17 = vector.shape_cast %16 : vector<1x8x4xbf16> to vector<8x4xbf16>
    %cst_16 = arith.constant dense<0.000000e+00> : vector<8x384xf32>
    %18 = tpu.matmul %17, %15, %cst_16 {dimension_numbers = #tpu.dot_dimension_numbers<[1], [0], [0], [1], [0, 0, 1, 1], [], []>} : vector<8x4xbf16>, vector<4x384xbf16>, vector<8x384xf32> -> vector<8x384xf32>
    %19 = arith.addf %14, %18 : vector<8x384xf32>
    %20 = vector.extract_strided_slice %4 {offsets = [0, 18], sizes = [4, 384], strides = [1, 1]} : vector<4x512xbf16> to vector<4x384xbf16>
    %c3 = arith.constant 3 : index
    %c0_17 = arith.constant 0 : index
    %c0_18 = arith.constant 0 : index
    %21 = vector.load %arg4[%c3, %c0_17, %c0_18] : memref<9x8x4xbf16, #tpu.memory_space<vmem>>, vector<1x8x4xbf16>
    %22 = vector.shape_cast %21 : vector<1x8x4xbf16> to vector<8x4xbf16>
    %cst_19 = arith.constant dense<0.000000e+00> : vector<8x384xf32>
    %23 = tpu.matmul %22, %20, %cst_19 {dimension_numbers = #tpu.dot_dimension_numbers<[1], [0], [0], [1], [0, 0, 1, 1], [], []>} : vector<8x4xbf16>, vector<4x384xbf16>, vector<8x384xf32> -> vector<8x384xf32>
    %24 = arith.addf %19, %23 : vector<8x384xf32>
    %25 = vector.extract_strided_slice %4 {offsets = [0, 19], sizes = [4, 384], strides = [1, 1]} : vector<4x512xbf16> to vector<4x384xbf16>
    %c4 = arith.constant 4 : index
    %c0_20 = arith.constant 0 : index
    %c0_21 = arith.constant 0 : index
    %26 = vector.load %arg4[%c4, %c0_20, %c0_21] : memref<9x8x4xbf16, #tpu.memory_space<vmem>>, vector<1x8x4xbf16>
    %27 = vector.shape_cast %26 : vector<1x8x4xbf16> to vector<8x4xbf16>
    %cst_22 = arith.constant dense<0.000000e+00> : vector<8x384xf32>
    %28 = tpu.matmul %27, %25, %cst_22 {dimension_numbers = #tpu.dot_dimension_numbers<[1], [0], [0], [1], [0, 0, 1, 1], [], []>} : vector<8x4xbf16>, vector<4x384xbf16>, vector<8x384xf32> -> vector<8x384xf32>
    %29 = arith.addf %24, %28 : vector<8x384xf32>
    %30 = vector.extract_strided_slice %4 {offsets = [0, 20], sizes = [4, 384], strides = [1, 1]} : vector<4x512xbf16> to vector<4x384xbf16>
    %c5 = arith.constant 5 : index
    %c0_23 = arith.constant 0 : index
    %c0_24 = arith.constant 0 : index
    %31 = vector.load %arg4[%c5, %c0_23, %c0_24] : memref<9x8x4xbf16, #tpu.memory_space<vmem>>, vector<1x8x4xbf16>
    %32 = vector.shape_cast %31 : vector<1x8x4xbf16> to vector<8x4xbf16>
    %cst_25 = arith.constant dense<0.000000e+00> : vector<8x384xf32>
    %33 = tpu.matmul %32, %30, %cst_25 {dimension_numbers = #tpu.dot_dimension_numbers<[1], [0], [0], [1], [0, 0, 1, 1], [], []>} : vector<8x4xbf16>, vector<4x384xbf16>, vector<8x384xf32> -> vector<8x384xf32>
    %34 = arith.addf %29, %33 : vector<8x384xf32>
    %35 = vector.extract_strided_slice %4 {offsets = [0, 36], sizes = [4, 384], strides = [1, 1]} : vector<4x512xbf16> to vector<4x384xbf16>
    %c6 = arith.constant 6 : index
    %c0_26 = arith.constant 0 : index
    %c0_27 = arith.constant 0 : index
    %36 = vector.load %arg4[%c6, %c0_26, %c0_27] : memref<9x8x4xbf16, #tpu.memory_space<vmem>>, vector<1x8x4xbf16>
    %37 = vector.shape_cast %36 : vector<1x8x4xbf16> to vector<8x4xbf16>
    %cst_28 = arith.constant dense<0.000000e+00> : vector<8x384xf32>
    %38 = tpu.matmul %37, %35, %cst_28 {dimension_numbers = #tpu.dot_dimension_numbers<[1], [0], [0], [1], [0, 0, 1, 1], [], []>} : vector<8x4xbf16>, vector<4x384xbf16>, vector<8x384xf32> -> vector<8x384xf32>
    %39 = arith.addf %34, %38 : vector<8x384xf32>
    %40 = vector.extract_strided_slice %4 {offsets = [0, 37], sizes = [4, 384], strides = [1, 1]} : vector<4x512xbf16> to vector<4x384xbf16>
    %c7 = arith.constant 7 : index
    %c0_29 = arith.constant 0 : index
    %c0_30 = arith.constant 0 : index
    %41 = vector.load %arg4[%c7, %c0_29, %c0_30] : memref<9x8x4xbf16, #tpu.memory_space<vmem>>, vector<1x8x4xbf16>
    %42 = vector.shape_cast %41 : vector<1x8x4xbf16> to vector<8x4xbf16>
    %cst_31 = arith.constant dense<0.000000e+00> : vector<8x384xf32>
    %43 = tpu.matmul %42, %40, %cst_31 {dimension_numbers = #tpu.dot_dimension_numbers<[1], [0], [0], [1], [0, 0, 1, 1], [], []>} : vector<8x4xbf16>, vector<4x384xbf16>, vector<8x384xf32> -> vector<8x384xf32>
    %44 = arith.addf %39, %43 : vector<8x384xf32>
    %45 = vector.extract_strided_slice %4 {offsets = [0, 38], sizes = [4, 384], strides = [1, 1]} : vector<4x512xbf16> to vector<4x384xbf16>
    %c8 = arith.constant 8 : index
    %c0_32 = arith.constant 0 : index
    %c0_33 = arith.constant 0 : index
    %46 = vector.load %arg4[%c8, %c0_32, %c0_33] : memref<9x8x4xbf16, #tpu.memory_space<vmem>>, vector<1x8x4xbf16>
    %47 = vector.shape_cast %46 : vector<1x8x4xbf16> to vector<8x4xbf16>
    %cst_34 = arith.constant dense<0.000000e+00> : vector<8x384xf32>
    %48 = tpu.matmul %47, %45, %cst_34 {dimension_numbers = #tpu.dot_dimension_numbers<[1], [0], [0], [1], [0, 0, 1, 1], [], []>} : vector<8x4xbf16>, vector<4x384xbf16>, vector<8x384xf32> -> vector<8x384xf32>
    %49 = arith.addf %44, %48 : vector<8x384xf32>
    %c0_35 = arith.constant 0 : index
    %c0_36 = arith.constant 0 : index
    %50 = vector.load %arg5[%c0_35, %c0_36] : memref<8x1xf32, #tpu.memory_space<vmem>>, vector<8x1xf32>
    %51 = vector.broadcast %50 : vector<8x1xf32> to vector<8x384xf32>
    %52 = arith.addf %49, %51 : vector<8x384xf32>
    %c0_37 = arith.constant 0 : index
    %c0_38 = arith.constant 0 : index
    %c0_39 = arith.constant 0 : index
    %53 = vector.load %arg6[%c0_37, %c0_38, %c0_39] : memref<1x8x384xf32, #tpu.memory_space<vmem>>, vector<1x8x384xf32>
    %54 = vector.shape_cast %53 : vector<1x8x384xf32> to vector<8x384xf32>
    %55 = vector.shape_cast %52 : vector<8x384xf32> to vector<1x8x384xf32>
    tpu.vector_store %arg6[%c0_37, %c0_38, %c0_39], %55 {strides = array<i32>} : memref<1x8x384xf32, #tpu.memory_space<vmem>>, vector<1x8x384xf32>,
    return
  }
  func.func @transform_0(%arg0: i32, %arg1: i32) -> (i32, i32, i32) {
    %c0_i32 = arith.constant 0 : i32
    %c0_i32_0 = arith.constant 0 : i32
    return %arg0, %c0_i32, %arg1 : i32, i32, i32
  }
  func.func @transform_1(%arg0: i32, %arg1: i32) -> (i32, i32, i32) {
    %c1_i32 = arith.constant 1 : i32
    %0 = arith.addi %arg1, %c1_i32 : i32
    %c3_i32 = arith.constant 3 : i32
    %1 = arith.muli %0, %c3_i32 : i32
    %c0_i32 = arith.constant 0 : i32
    %c0_i32_0 = arith.constant 0 : i32
    return %arg0, %c0_i32, %1 : i32, i32, i32
  }
  func.func @transform_2(%arg0: i32, %arg1: i32) -> (i32, i32, i32) {
    %c0_i32 = arith.constant 0 : i32
    %c0_i32_0 = arith.constant 0 : i32
    %c0_i32_1 = arith.constant 0 : i32
    %c0_i32_2 = arith.constant 0 : i32
    return %c0_i32, %c0_i32_0, %c0_i32_1 : i32, i32, i32
  }
  func.func @transform_3(%arg0: i32, %arg1: i32) -> (i32, i32) {
    %c0_i32 = arith.constant 0 : i32
    %c0_i32_0 = arith.constant 0 : i32
    %c0_i32_1 = arith.constant 0 : i32
    return %c0_i32, %c0_i32_0 : i32, i32
  }
  func.func @transform_4(%arg0: i32, %arg1: i32) -> (i32, i32, i32) {
    %c0_i32 = arith.constant 0 : i32
    %c0_i32_0 = arith.constant 0 : i32
    return %arg0, %c0_i32, %arg1 : i32, i32, i32
  }
}

module attributes {stable_mosaic.version = 11 : i64} {
  func.func @kernel(%arg0: i32, %arg1: i32, %arg2: memref<1x4x384xbf16, #tpu.memory_space<vmem>>, %arg3: memref<1x4x128xbf16, #tpu.memory_space<vmem>>, %arg4: memref<9x8x4xbf16, #tpu.memory_space<vmem>>, %arg5: memref<8x1xf32, #tpu.memory_space<vmem>>, %arg6: memref<1x8x384xf32, #tpu.memory_space<vmem>>) attributes {dimension_semantics = [#tpu.dimension_semantics<parallel>, #tpu.dimension_semantics<parallel>], iteration_bounds = array<i64: 2, 1>, scalar_prefetch = 0 : i64, scratch_operands = 0 : i64, tpu.core_type = #tpu.core_type<tc>, window_params = [{transform_indices = @transform_0, window_bounds = array<i64: 1, 4, 384>}, {transform_indices = @transform_1, window_bounds = array<i64: 1, 4, 128>}, {pipeline_mode = #tpu.pipeline_mode<synchronous>, transform_indices = @transform_2, window_bounds = array<i64: 9, 8, 4>}, {pipeline_mode = #tpu.pipeline_mode<synchronous>, transform_indices = @transform_3, window_bounds = array<i64: 8, 1>}, {transform_indices = @transform_4, window_bounds = array<i64: 1, 8, 384>}]} {
    %c0 = arith.constant 0 : index
    %c0_0 = arith.constant 0 : index
    %c0_1 = arith.constant 0 : index
    %0 = vector.load %arg2[%c0, %c0_0, %c0_1] : memref<1x4x384xbf16, #tpu.memory_space<vmem>>, vector<1x4x384xbf16>
    %1 = vector.shape_cast %0 : vector<1x4x384xbf16> to vector<4x384xbf16>
    %c0_2 = arith.constant 0 : index
    %c0_3 = arith.constant 0 : index
    %c0_4 = arith.constant 0 : index
    %2 = vector.load %arg3[%c0_2, %c0_3, %c0_4] : memref<1x4x128xbf16, #tpu.memory_space<vmem>>, vector<1x4x128xbf16>
    %3 = vector.shape_cast %2 : vector<1x4x128xbf16> to vector<4x128xbf16>
    %4 = tpu.concatenate %1, %3 in 1 : vector<4x384xbf16>, vector<4x128xbf16> -> vector<4x512xbf16>
    %c0_5 = arith.constant 0 : index
    %c0_6 = arith.constant 0 : index
    %c0_7 = arith.constant 0 : index
    %5 = vector.load %arg2[%c0_5, %c0_6, %c0_7] : memref<1x4x384xbf16, #tpu.memory_space<vmem>>, vector<1x4x384xbf16>
    %6 = vector.shape_cast %5 : vector<1x4x384xbf16> to vector<4x384xbf16>
    %c0_8 = arith.constant 0 : index
    %c0_9 = arith.constant 0 : index
    %c0_10 = arith.constant 0 : index
    %7 = vector.load %arg4[%c0_8, %c0_9, %c0_10] : memref<9x8x4xbf16, #tpu.memory_space<vmem>>, vector<1x8x4xbf16>
    %8 = vector.shape_cast %7 : vector<1x8x4xbf16> to vector<8x4xbf16>
    %cst = arith.constant dense<0.000000e+00> : vector<8x384xf32>
    %9 = tpu.matmul %8, %6, %cst {dimension_numbers = #tpu.dot_dimension_numbers<[1], [0], [0], [1], [0, 0, 1, 1], [], []>} : vector<8x4xbf16>, vector<4x384xbf16>, vector<8x384xf32> -> vector<8x384xf32>
    %10 = vector.extract_strided_slice %4 {offsets = [0, 1], sizes = [4, 384], strides = [1, 1]} : vector<4x512xbf16> to vector<4x384xbf16>
    %c1 = arith.constant 1 : index
    %c0_11 = arith.constant 0 : index
    %c0_12 = arith.constant 0 : index
    %11 = vector.load %arg4[%c1, %c0_11, %c0_12] : memref<9x8x4xbf16, #tpu.memory_space<vmem>>, vector<1x8x4xbf16>
    %12 = vector.shape_cast %11 : vector<1x8x4xbf16> to vector<8x4xbf16>
    %cst_13 = arith.constant dense<0.000000e+00> : vector<8x384xf32>
    %13 = tpu.matmul %12, %10, %cst_13 {dimension_numbers = #tpu.dot_dimension_numbers<[1], [0], [0], [1], [0, 0, 1, 1], [], []>} : vector<8x4xbf16>, vector<4x384xbf16>, vector<8x384xf32> -> vector<8x384xf32>
    %14 = arith.addf %9, %13 : vector<8x384xf32>
    %15 = vector.extract_strided_slice %4 {offsets = [0, 2], sizes = [4, 384], strides = [1, 1]} : vector<4x512xbf16> to vector<4x384xbf16>
    %c2 = arith.constant 2 : index
    %c0_14 = arith.constant 0 : index
    %c0_15 = arith.constant 0 : index
    %16 = vector.load %arg4[%c2, %c0_14, %c0_15] : memref<9x8x4xbf16, #tpu.memory_space<vmem>>, vector<1x8x4xbf16>
    %17 = vector.shape_cast %16 : vector<1x8x4xbf16> to vector<8x4xbf16>
    %cst_16 = arith.constant dense<0.000000e+00> : vector<8x384xf32>
    %18 = tpu.matmul %17, %15, %cst_16 {dimension_numbers = #tpu.dot_dimension_numbers<[1], [0], [0], [1], [0, 0, 1, 1], [], []>} : vector<8x4xbf16>, vector<4x384xbf16>, vector<8x384xf32> -> vector<8x384xf32>
    %19 = arith.addf %14, %18 : vector<8x384xf32>
    %20 = vector.extract_strided_slice %4 {offsets = [0, 18], sizes = [4, 384], strides = [1, 1]} : vector<4x512xbf16> to vector<4x384xbf16>
    %c3 = arith.constant 3 : index
    %c0_17 = arith.constant 0 : index
    %c0_18 = arith.constant 0 : index
    %21 = vector.load %arg4[%c3, %c0_17, %c0_18] : memref<9x8x4xbf16, #tpu.memory_space<vmem>>, vector<1x8x4xbf16>
    %22 = vector.shape_cast %21 : vector<1x8x4xbf16> to vector<8x4xbf16>
    %cst_19 = arith.constant dense<0.000000e+00> : vector<8x384xf32>
    %23 = tpu.matmul %22, %20, %cst_19 {dimension_numbers = #tpu.dot_dimension_numbers<[1], [0], [0], [1], [0, 0, 1, 1], [], []>} : vector<8x4xbf16>, vector<4x384xbf16>, vector<8x384xf32> -> vector<8x384xf32>
    %24 = arith.addf %19, %23 : vector<8x384xf32>
    %25 = vector.extract_strided_slice %4 {offsets = [0, 19], sizes = [4, 384], strides = [1, 1]} : vector<4x512xbf16> to vector<4x384xbf16>
    %c4 = arith.constant 4 : index
    %c0_20 = arith.constant 0 : index
    %c0_21 = arith.constant 0 : index
    %26 = vector.load %arg4[%c4, %c0_20, %c0_21] : memref<9x8x4xbf16, #tpu.memory_space<vmem>>, vector<1x8x4xbf16>
    %27 = vector.shape_cast %26 : vector<1x8x4xbf16> to vector<8x4xbf16>
    %cst_22 = arith.constant dense<0.000000e+00> : vector<8x384xf32>
    %28 = tpu.matmul %27, %25, %cst_22 {dimension_numbers = #tpu.dot_dimension_numbers<[1], [0], [0], [1], [0, 0, 1, 1], [], []>} : vector<8x4xbf16>, vector<4x384xbf16>, vector<8x384xf32> -> vector<8x384xf32>
    %29 = arith.addf %24, %28 : vector<8x384xf32>
    %30 = vector.extract_strided_slice %4 {offsets = [0, 20], sizes = [4, 384], strides = [1, 1]} : vector<4x512xbf16> to vector<4x384xbf16>
    %c5 = arith.constant 5 : index
    %c0_23 = arith.constant 0 : index
    %c0_24 = arith.constant 0 : index
    %31 = vector.load %arg4[%c5, %c0_23, %c0_24] : memref<9x8x4xbf16, #tpu.memory_space<vmem>>, vector<1x8x4xbf16>
    %32 = vector.shape_cast %31 : vector<1x8x4xbf16> to vector<8x4xbf16>
    %cst_25 = arith.constant dense<0.000000e+00> : vector<8x384xf32>
    %33 = tpu.matmul %32, %30, %cst_25 {dimension_numbers = #tpu.dot_dimension_numbers<[1], [0], [0], [1], [0, 0, 1, 1], [], []>} : vector<8x4xbf16>, vector<4x384xbf16>, vector<8x384xf32> -> vector<8x384xf32>
    %34 = arith.addf %29, %33 : vector<8x384xf32>
    %35 = vector.extract_strided_slice %4 {offsets = [0, 36], sizes = [4, 384], strides = [1, 1]} : vector<4x512xbf16> to vector<4x384xbf16>
    %c6 = arith.constant 6 : index
    %c0_26 = arith.constant 0 : index
    %c0_27 = arith.constant 0 : index
    %36 = vector.load %arg4[%c6, %c0_26, %c0_27] : memref<9x8x4xbf16, #tpu.memory_space<vmem>>, vector<1x8x4xbf16>
    %37 = vector.shape_cast %36 : vector<1x8x4xbf16> to vector<8x4xbf16>
    %cst_28 = arith.constant dense<0.000000e+00> : vector<8x384xf32>
    %38 = tpu.matmul %37, %35, %cst_28 {dimension_numbers = #tpu.dot_dimension_numbers<[1], [0], [0], [1], [0, 0, 1, 1], [], []>} : vector<8x4xbf16>, vector<4x384xbf16>, vector<8x384xf32> -> vector<8x384xf32>
    %39 = arith.addf %34, %38 : vector<8x384xf32>
    %40 = vector.extract_strided_slice %4 {offsets = [0, 37], sizes = [4, 384], strides = [1, 1]} : vector<4x512xbf16> to vector<4x384xbf16>
    %c7 = arith.constant 7 : index
    %c0_29 = arith.constant 0 : index
    %c0_30 = arith.constant 0 : index
    %41 = vector.load %arg4[%c7, %c0_29, %c0_30] : memref<9x8x4xbf16, #tpu.memory_space<vmem>>, vector<1x8x4xbf16>
    %42 = vector.shape_cast %41 : vector<1x8x4xbf16> to vector<8x4xbf16>
    %cst_31 = arith.constant dense<0.000000e+00> : vector<8x384xf32>
    %43 = tpu.matmul %42, %40, %cst_31 {dimension_numbers = #tpu.dot_dimension_numbers<[1], [0], [0], [1], [0, 0, 1, 1], [], []>} : vector<8x4xbf16>, vector<4x384xbf16>, vector<8x384xf32> -> vector<8x384xf32>
    %44 = arith.addf %39, %43 : vector<8x384xf32>
    %45 = vector.extract_strided_slice %4 {offsets = [0, 38], sizes = [4, 384], strides = [1, 1]} : vector<4x512xbf16> to vector<4x384xbf16>
    %c8 = arith.constant 8 : index
    %c0_32 = arith.constant 0 : index
    %c0_33 = arith.constant 0 : index
    %46 = vector.load %arg4[%c8, %c0_32, %c0_33] : memref<9x8x4xbf16, #tpu.memory_space<vmem>>, vector<1x8x4xbf16>
    %47 = vector.shape_cast %46 : vector<1x8x4xbf16> to vector<8x4xbf16>
    %cst_34 = arith.constant dense<0.000000e+00> : vector<8x384xf32>
    %48 = tpu.matmul %47, %45, %cst_34 {dimension_numbers = #tpu.dot_dimension_numbers<[1], [0], [0], [1], [0, 0, 1, 1], [], []>} : vector<8x4xbf16>, vector<4x384xbf16>, vector<8x384xf32> -> vector<8x384xf32>
    %49 = arith.addf %44, %48 : vector<8x384xf32>
    %c0_35 = arith.constant 0 : index
    %c0_36 = arith.constant 0 : index
    %50 = vector.load %arg5[%c0_35, %c0_36] : memref<8x1xf32, #tpu.memory_space<vmem>>, vector<8x1xf32>
    %51 = vector.broadcast %50 : vector<8x1xf32> to vector<8x384xf32>
    %52 = arith.addf %49, %51 : vector<8x384xf32>
    %c0_37 = arith.constant 0 : index
    %c0_38 = arith.constant 0 : index
    %c0_39 = arith.constant 0 : index
    %53 = vector.load %arg6[%c0_37, %c0_38, %c0_39] : memref<1x8x384xf32, #tpu.memory_space<vmem>>, vector<1x8x384xf32>
    %54 = vector.shape_cast %53 : vector<1x8x384xf32> to vector<8x384xf32>
    %55 = vector.shape_cast %52 : vector<8x384xf32> to vector<1x8x384xf32>
    tpu.vector_store %arg6[%c0_37, %c0_38, %c0_39], %55 {strides = array<i32>} : memref<1x8x384xf32, #tpu.memory_space<vmem>>, vector<1x8x384xf32>,
    return
  }
  func.func @transform_0(%arg0: i32, %arg1: i32) -> (i32, i32, i32) {
    %c0_i32 = arith.constant 0 : i32
    %c0_i32_0 = arith.constant 0 : i32
    return %arg0, %c0_i32, %arg1 : i32, i32, i32
  }
  func.func @transform_1(%arg0: i32, %arg1: i32) -> (i32, i32, i32) {
    %c1_i32 = arith.constant 1 : i32
    %0 = arith.addi %arg1, %c1_i32 : i32
    %c3_i32 = arith.constant 3 : i32
    %1 = arith.muli %0, %c3_i32 : i32
    %c0_i32 = arith.constant 0 : i32
    %c0_i32_0 = arith.constant 0 : i32
    return %arg0, %c0_i32, %1 : i32, i32, i32
  }
  func.func @transform_2(%arg0: i32, %arg1: i32) -> (i32, i32, i32) {
    %c0_i32 = arith.constant 0 : i32
    %c0_i32_0 = arith.constant 0 : i32
    %c0_i32_1 = arith.constant 0 : i32
    %c0_i32_2 = arith.constant 0 : i32
    return %c0_i32, %c0_i32_0, %c0_i32_1 : i32, i32, i32
  }
  func.func @transform_3(%arg0: i32, %arg1: i32) -> (i32, i32) {
    %c0_i32 = arith.constant 0 : i32
    %c0_i32_0 = arith.constant 0 : i32
    %c0_i32_1 = arith.constant 0 : i32
    return %c0_i32, %c0_i32_0 : i32, i32
  }
  func.func @transform_4(%arg0: i32, %arg1: i32) -> (i32, i32, i32) {
    %c0_i32 = arith.constant 0 : i32
    %c0_i32_0 = arith.constant 0 : i32
    return %arg0, %c0_i32, %arg1 : i32, i32, i32
  }
}

</mosaic_0001>

<bundles_post_ra>
// kernel: _masked_conv2d_forward.1
= control target key start
LH: loop header
LB: loop body
LE: loop exit
PB: predicated region body
PF: predicated region fallthrough
CT: control target
= control target key end

     0   :  { %s1636_s15 = smov 0   ;;  %s1638_s16 = smov 0   ;;  %s1812_s0 = inlined_call_operand.vmem [shape: bf16[2,4,512], index: 0, kind: input, shape index: {}, may-alias: {0,1}]   ;;  %s1813_s1 = inlined_call_operand.vmem [shape: bf16[2,4,512], index: 1, kind: input, shape index: {}, may-alias: {0,1}]   ;;  %s1814_s2 = inlined_call_operand.vmem [shape: bf16[9,8,4], index: 2, kind: input, shape index: {}]   ;;  %s1815_s3 = inlined_call_operand.vmem [shape: f32[8,1], index: 3, kind: input, shape index: {}]   ;;  %s1816_s4 = inlined_call_operand.vmem [shape: f32[2,8,384], index: 4, kind: output, shape index: {}]  }
   0x1   :  { %s1640_s17 = smov 0  }
   0x2 LB: > { %s26_s18 = sadd.s32 1, %s1593_s16  ;;  %p1417_p0 = scmp.ge.s32.totalorder %s1597_s17, 1  ;;  %s1597_s17 = sphi %s1640_s17, %s14_s17   ;;  %s1593_s16 = sphi %s1638_s16, %s1818_s16   ;;  %s1589_s15 = sphi %s1636_s15, %s1817_s15  }
   0x3   : > { %p28_p1 = scmp.ge.s32.totalorder %s26_s18, 2  ;;  %p214_p2 = scmp.lt.s32.totalorder %s1597_s17, 3 }
   0x5   : > { %s1820_s18 = smov (%p28_p1, %s26_s18), 0  ;;  %p215_p3 = pnand %p1417_p0, %p214_p2 }
   0x6   : > { %p267_p4 = scmp.lt.s32.totalorder (!%p215_p3), %s1589_s15, 1  ;;  %v310_v0 = vlaneseq (!%p215_p3)  ;;  %v1599_v1 = vmov (!%p215_p3), 1983009808   ;;  %v1600_v5 = vmov (!%p215_p3), 0.0   ;;  %v1601_v6 = vmov (!%p215_p3), 0   ;;  %s1603_s24 = smov (!%p215_p3), 127  }
   0x7   : > { %218 = sbr.rel (%p215_p3) target bundleno = 427 (0x1ab), region = 36  ;;  %v308_v2 = vunpack.c.l.s4 (!%p215_p3), %v1599_v1  ;;  %1482 = vmatprep.subr.bf16.mxu1 (!%p215_p3), %v1600_v5  ;;  %384 = vmatprep.mubr.bf16.mxu0 (!%p215_p3), %v1601_v6  ;;  %vm1602_vm0 = vmmov (!%p215_p3), 0   ;;  %s1604_s28 = smov (!%p215_p3), 126   ;;  %v1296_v14 = vld [vmem:[%s1815_s3] sm:$0xff] (!%p215_p3)  ;;  %vm334_vm1 = vcmask (!%p215_p3), 1039360   ;;  %vm342_vm2 = vcmask (!%p215_p3), 1041408  }
   0x8   : > { %v311_v3 = vshrl.u32 (!%p215_p3), %v310_v0, 7  ;;  %1573 = vset.pattern.permute.xlu0 (!%p215_p3), %v1601_v6  ;;  %1484 = vmatprep.mubr.msk.bf16.mxu1 (!%p215_p3), %vm1602_vm0, %v1600_v5  ;;  %s1605_s29 = smov (!%p215_p3), 110   ;;  %s1606_s30 = smov (!%p215_p3), 109   ;;  %v1423_v23 = vld [vmem:[%s1814_s2 + $0x4] sm:$0xf] (!%p215_p3)  ;;  %vm338_vm3 = vcmask (!%p215_p3), 31744  }
   0x9   : > { %v309_v4 = vunpack.c.0.s8 (!%p215_p3), %v308_v2  ;;  %s1607_s5 = smov (!%p215_p3), 108   ;;  %s1608_s6 = smov (!%p215_p3), 92   ;;  %vm536_vm4 = vcmask (!%p215_p3), 1031168   ;;  %v322_v34 = vld [vmem:[%s1814_s2] sm:$0xf] (!%p215_p3)  ;;  %vm646_vm5 = vcmask (!%p215_p3), 900096  }
   0xa   : > { %s1609_s7 = smov (!%p215_p3), 91   ;;  %s1610_s8 = smov (!%p215_p3), 90   ;;  %v1430_v44 = vld [vmem:[%s1814_s2 + $0x8] sm:$0xf] (!%p215_p3)  ;;  %vm756_vm6 = vcmask (!%p215_p3), 891904   ;;  %vm866_vm7 = vcmask (!%p215_p3), 883712  }
   0xb   : > { %v312_v7 = vsub.s32 (!%p215_p3), %v309_v4, %v311_v3  ;;  %v1434_v54 = vld [vmem:[%s1814_s2 + $0xc] sm:$0xf] (!%p215_p3)  ;;  %v1438_v0 = vld [vmem:[%s1814_s2 + $0x10] sm:$0xf] (!%p215_p3)  ;;  %vm976_vm8 = vcmask (!%p215_p3), 752640   ;;  %vm1086_vm9 = vcmask (!%p215_p3), 744448  }
   0xc   : > { %vm1196_vm10 = vcmask (!%p215_p3), 736256  }
   0xe   : > { %s1822_s15 = smov (!%p267_p4, %s1589_s15), 1 }
   0xf   : > { %s1460_s19 = sshll.u32 %s1822_s15, 3 }
  0x10   : > { %s274_s22 = scalar_lea.vmem %s1812_s0, %s1460_s19  ;;  %s1462_s23 = sadd.s32 6, %s1460_s19 }
  0x11   : > { %v303_v8 = vld [vmem:[%s274_s22] sm:$0x3f]  ;;  %s289_s27 = scalar_lea.vmem %s1813_s1, %s1462_s23 }
  0x12   : > { %v1665_v9 = vrot.slane %v303_v8, %v312_v7  ;;  %v306_v10 = vcombine.high %v303_v8, %v303_v8  ;;  %v304_v13 = vld [vmem:[%s289_s27] sm:$0x3] }
  0x14   : > { %326 = vrot.lane.b32.xlu0 %v1665_v9, %s1603_s24  ;;  %v1668_v11 = vrot.slane %v306_v10, %v312_v7  ;;  %v321_v12 = vcombine.high %v1665_v9, %v1665_v9  ;;  %v437_v26 = vsel %vm342_vm2, %v1665_v9, 0 }
  0x16   : > { %330 = vrot.lane.b32.xlu1 %v1668_v11, %s1603_s24  ;;  %v443_v28 = vsel %vm342_vm2, %v1668_v11, 0 }
  0x18   : > { %328 = vrot.lane.b32.xlu0 %v321_v12, %s1603_s24 }
  0x1a   : > { %332 = vrot.lane.b32.xlu1 %v304_v13, %s1603_s24 }
  0x1c   : > { %528 = vrot.lane.b32.xlu0 %v1665_v9, %s1604_s28 }
  0x1e   : > { %530 = vrot.lane.b32.xlu1 %v321_v12, %s1604_s28 }
  0x20   : > { %532 = vrot.lane.b32.xlu0 %v1668_v11, %s1604_s28 }
  0x22   : > { %534 = vrot.lane.b32.xlu1 %v304_v13, %s1604_s28 }
  0x24   : > { %638 = vrot.lane.b32.xlu0 %v1665_v9, %s1605_s29 }
  0x26   : > { %640 = vrot.lane.b32.xlu1 %v321_v12, %s1605_s29 }
  0x28   : > { %642 = vrot.lane.b32.xlu0 %v1668_v11, %s1605_s29 }
  0x2a   : > { %644 = vrot.lane.b32.xlu1 %v304_v13, %s1605_s29 }
  0x2c   : > { %748 = vrot.lane.b32.xlu0 %v1665_v9, %s1606_s30 }
  0x2e   : > { %750 = vrot.lane.b32.xlu1 %v321_v12, %s1606_s30 }
  0x30   : > { %752 = vrot.lane.b32.xlu0 %v1668_v11, %s1606_s30 }
  0x32   : > { %754 = vrot.lane.b32.xlu1 %v304_v13, %s1606_s30 }
  0x34   : > { %858 = vrot.lane.b32.xlu0 %v1665_v9, %s1607_s5 }
  0x36   : > { %860 = vrot.lane.b32.xlu1 %v321_v12, %s1607_s5 }
  0x38   : > { %862 = vrot.lane.b32.xlu0 %v1668_v11, %s1607_s5 }
  0x3a   : > { %864 = vrot.lane.b32.xlu1 %v304_v13, %s1607_s5 }
  0x3c   : > { %968 = vrot.lane.b32.xlu0 %v1665_v9, %s1608_s6 }
  0x3e   : > { %970 = vrot.lane.b32.xlu1 %v321_v12, %s1608_s6 }
  0x40   : > { %972 = vrot.lane.b32.xlu0 %v1668_v11, %s1608_s6 }
  0x42   : > { %974 = vrot.lane.b32.xlu1 %v304_v13, %s1608_s6 }
  0x44   : > { %1078 = vrot.lane.b32.xlu0 %v1665_v9, %s1609_s7 }
  0x46   : > { %1080 = vrot.lane.b32.xlu1 %v321_v12, %s1609_s7 }
  0x48   : > { %1082 = vrot.lane.b32.xlu0 %v1668_v11, %s1609_s7 }
  0x4a   : > { %1084 = vrot.lane.b32.xlu1 %v304_v13, %s1609_s7  ;;  %s1536_s7 = smul.u32 24, %s1822_s15 }
  0x4c   : > { %1188 = vrot.lane.b32.xlu0 %v1665_v9, %s1610_s8  ;;  %s300_s10 = scalar_lea.vmem %s1816_s4, %s1536_s7 }
  0x4e   : > { %1190 = vrot.lane.b32.xlu1 %v321_v12, %s1610_s8 }
  0x50   : > { %1192 = vrot.lane.b32.xlu0 %v1668_v11, %s1610_s8 }
  0x52   : > { %1194 = vrot.lane.b32.xlu1 %v304_v13, %s1610_s8 }
  0x54   : > { %1299 = vperm.xlu0 %1573, %v1296_v14  }
  0x86   : > { %v327_v15 = vpop.permute.xlu0 %326 }
  0x88   : > { %v331_v16 = vpop.permute.xlu1 %330 }
  0x8a   : > { %v329_v17 = vpop.permute.xlu0 %328 }
  0x8b   : > { %v336_v18 = vsel %vm334_vm1, %v329_v17, %v331_v16  ;;  %v335_v19 = vsel %vm334_vm1, %v327_v15, %v329_v17 }
  0x8c   : > { %1424 = vmatprep.subr.msk.bf16.mxu0 %vm342_vm2, %v336_v18  ;;  %v333_v20 = vpop.permute.xlu1 %332  ;;  %v344_v21 = vsel %vm342_vm2, %v335_v19, 0 }
  0x8d   : > { %353 = vmatpush1.bf16.msra.mxu0 %v344_v21  ;;  %v337_v22 = vsel %vm334_vm1, %v331_v16, %v333_v20 }
  0x8e   : > { %v350_v24 = vsel %vm342_vm2, %v337_v22, 0  ;;  %v529_v25 = vpop.permute.xlu0 %528  ;;  %1427 = vmatprep.subr.msk.bf16.mxu0 %vm342_vm2, %v321_v12  ;;  %v1442_v12 = vld [vmem:[%s1814_s2 + $0x14] sm:$0xf]  ;;  %v1446_v22 = vld [vmem:[%s1814_s2 + $0x18] sm:$0xf] }
  0x8f   : > { %1483 = vmatpush3.bf16.msra.mxu1 %v350_v24 }
  0x90   : > { %1425 = vmatmul.mubr.msk.bf16.vlgmr.msra.gmra.mrb[0].mxu0 %vm338_vm3, %v1423_v23  ;;  %1488 = vmatprep.subr.bf16.mxu1 %v1600_v5  ;;  %v531_v27 = vpop.permute.xlu1 %530 }
  0x91   : > { %446 = vmatpush1.bf16.msra.mxu0 %v437_v26  ;;  %477 = vmatprep.mubr.bf16.mxu0 %v1601_v6  ;;  %v537_v30 = vsel %vm536_vm4, %v529_v25, %v531_v27 }
  0x92   : > { %1485 = vmatmul.mubr.msk.bf16.vlgmr.msra.gmra.mrb[0].mxu1 %vm338_vm3, %v1423_v23  ;;  %v533_v29 = vpop.permute.xlu0 %532  ;;  %v544_v35 = vsel %vm342_vm2, %v537_v30, 0 }
  0x93   : > { %1489 = vmatpush3.bf16.msra.mxu1 %v443_v28  ;;  %v538_v31 = vsel %vm536_vm4, %v531_v27, %v533_v29  ;;  %1490 = vmatprep.mubr.msk.bf16.mxu1 %vm1602_vm0, %v1600_v5 }
  0x94   : > { %1431 = vmatprep.subr.msk.bf16.mxu0 %vm342_vm2, %v538_v31  ;;  %v535_v32 = vpop.permute.xlu1 %534  ;;  %1494 = vmatprep.subr.bf16.mxu1 %v1600_v5 }
  0x95   : > { %v539_v33 = vsel %vm536_vm4, %v533_v29, %v535_v32  ;;  %v1450_v32 = vld [vmem:[%s1814_s2 + $0x1c] sm:$0xf] }
  0x96   : > { %v639_v36 = vpop.permute.xlu0 %638  ;;  %v550_v37 = vsel %vm342_vm2, %v539_v33, 0 }
  0x98   : > { %1428 = vmatmul.mubr.msk.bf16.vlgmr.msra.gmra.mrb[4].mxu0 %vm338_vm3, %v322_v34  ;;  %v641_v38 = vpop.permute.xlu1 %640 }
  0x99   : > { %553 = vmatpush1.bf16.msra.mxu0 %v544_v35  ;;  %584 = vmatprep.mubr.bf16.mxu0 %v1601_v6  ;;  %v647_v40 = vsel %vm646_vm5, %v639_v36, %v641_v38  ;;  %v1454_v35 = vld [vmem:[%s1814_s2 + $0x20] sm:$0xf] }
  0x9a   : > { %1491 = vmatmul.mubr.msk.bf16.vlgmr.msra.gmra.mrb[4].mxu1 %vm338_vm3, %v322_v34  ;;  %v643_v39 = vpop.permute.xlu0 %642  ;;  %v654_v45 = vsel %vm342_vm2, %v647_v40, 0 }
  0x9b   : > { %1495 = vmatpush3.bf16.msra.mxu1 %v550_v37  ;;  %v648_v41 = vsel %vm646_vm5, %v641_v38, %v643_v39  ;;  %1496 = vmatprep.mubr.msk.bf16.mxu1 %vm1602_vm0, %v1600_v5 }
  0x9c   : > { %1435 = vmatprep.subr.msk.bf16.mxu0 %vm342_vm2, %v648_v41  ;;  %v645_v42 = vpop.permute.xlu1 %644  ;;  %1500 = vmatprep.subr.bf16.mxu1 %v1600_v5 }
  0x9d   : > { %v649_v43 = vsel %vm646_vm5, %v643_v39, %v645_v42 }
  0x9e   : > { %v749_v46 = vpop.permute.xlu0 %748  ;;  %v660_v47 = vsel %vm342_vm2, %v649_v43, 0 }
  0xa0   : > { %1432 = vmatmul.mubr.msk.bf16.vlgmr.msra.gmra.mrb[8].mxu0 %vm338_vm3, %v1430_v44  ;;  %v751_v48 = vpop.permute.xlu1 %750 }
  0xa1   : > { %663 = vmatpush1.bf16.msra.mxu0 %v654_v45  ;;  %694 = vmatprep.mubr.bf16.mxu0 %v1601_v6  ;;  %v757_v50 = vsel %vm756_vm6, %v749_v46, %v751_v48 }
  0xa2   : > { %1497 = vmatmul.mubr.msk.bf16.vlgmr.msra.gmra.mrb[8].mxu1 %vm338_vm3, %v1430_v44  ;;  %v753_v49 = vpop.permute.xlu0 %752  ;;  %v764_v55 = vsel %vm342_vm2, %v757_v50, 0 }
  0xa3   : > { %1501 = vmatpush3.bf16.msra.mxu1 %v660_v47  ;;  %v758_v51 = vsel %vm756_vm6, %v751_v48, %v753_v49  ;;  %1502 = vmatprep.mubr.msk.bf16.mxu1 %vm1602_vm0, %v1600_v5 }
  0xa4   : > { %1439 = vmatprep.subr.msk.bf16.mxu0 %vm342_vm2, %v758_v51  ;;  %v755_v52 = vpop.permute.xlu1 %754  ;;  %1506 = vmatprep.subr.bf16.mxu1 %v1600_v5 }
  0xa5   : > { %v759_v53 = vsel %vm756_vm6, %v753_v49, %v755_v52 }
  0xa6   : > { %v859_v56 = vpop.permute.xlu0 %858  ;;  %v770_v57 = vsel %vm342_vm2, %v759_v53, 0 }
  0xa8   : > { %1436 = vmatmul.mubr.msk.bf16.vlgmr.msra.gmra.mrb[12].mxu0 %vm338_vm3, %v1434_v54  ;;  %v861_v58 = vpop.permute.xlu1 %860 }
  0xa9   : > { %773 = vmatpush1.bf16.msra.mxu0 %v764_v55  ;;  %804 = vmatprep.mubr.bf16.mxu0 %v1601_v6  ;;  %v867_v60 = vsel %vm866_vm7, %v859_v56, %v861_v58 }
  0xaa   : > { %1503 = vmatmul.mubr.msk.bf16.vlgmr.msra.gmra.mrb[12].mxu1 %vm338_vm3, %v1434_v54  ;;  %v863_v59 = vpop.permute.xlu0 %862  ;;  %v874_v1 = vsel %vm342_vm2, %v867_v60, 0 }
  0xab   : > { %1507 = vmatpush3.bf16.msra.mxu1 %v770_v57  ;;  %v868_v61 = vsel %vm866_vm7, %v861_v58, %v863_v59  ;;  %1508 = vmatprep.mubr.msk.bf16.mxu1 %vm1602_vm0, %v1600_v5 }
  0xac   : > { %1443 = vmatprep.subr.msk.bf16.mxu0 %vm342_vm2, %v868_v61  ;;  %v865_v62 = vpop.permute.xlu1 %864  ;;  %1512 = vmatprep.subr.bf16.mxu1 %v1600_v5 }
  0xad   : > { %v869_v63 = vsel %vm866_vm7, %v863_v59, %v865_v62 }
  0xae   : > { %v969_v2 = vpop.permute.xlu0 %968  ;;  %v880_v3 = vsel %vm342_vm2, %v869_v63, 0 }
  0xb0   : > { %1440 = vmatmul.mubr.msk.bf16.vlgmr.msra.gmra.mrb[16].mxu0 %vm338_vm3, %v1438_v0  ;;  %v971_v4 = vpop.permute.xlu1 %970 }
  0xb1   : > { %883 = vmatpush1.bf16.msra.mxu0 %v874_v1  ;;  %914 = vmatprep.mubr.bf16.mxu0 %v1601_v6  ;;  %v977_v8 = vsel %vm976_vm8, %v969_v2, %v971_v4 }
  0xb2   : > { %1509 = vmatmul.mubr.msk.bf16.vlgmr.msra.gmra.mrb[16].mxu1 %vm338_vm3, %v1438_v0  ;;  %v973_v7 = vpop.permute.xlu0 %972  ;;  %v984_v13 = vsel %vm342_vm2, %v977_v8, 0 }
  0xb3   : > { %1513 = vmatpush3.bf16.msra.mxu1 %v880_v3  ;;  %v978_v9 = vsel %vm976_vm8, %v971_v4, %v973_v7  ;;  %1514 = vmatprep.mubr.msk.bf16.mxu1 %vm1602_vm0, %v1600_v5 }
  0xb4   : > { %1447 = vmatprep.subr.msk.bf16.mxu0 %vm342_vm2, %v978_v9  ;;  %v975_v10 = vpop.permute.xlu1 %974  ;;  %1518 = vmatprep.subr.bf16.mxu1 %v1600_v5 }
  0xb5   : > { %v979_v11 = vsel %vm976_vm8, %v973_v7, %v975_v10 }
  0xb6   : > { %v1079_v14 = vpop.permute.xlu0 %1078  ;;  %v990_v15 = vsel %vm342_vm2, %v979_v11, 0 }
  0xb8   : > { %1444 = vmatmul.mubr.msk.bf16.vlgmr.msra.gmra.mrb[20].mxu0 %vm338_vm3, %v1442_v12  ;;  %v1081_v16 = vpop.permute.xlu1 %1080 }
  0xb9   : > { %993 = vmatpush1.bf16.msra.mxu0 %v984_v13  ;;  %1024 = vmatprep.mubr.bf16.mxu0 %v1601_v6  ;;  %v1087_v18 = vsel %vm1086_vm9, %v1079_v14, %v1081_v16 }
  0xba   : > { %1515 = vmatmul.mubr.msk.bf16.vlgmr.msra.gmra.mrb[20].mxu1 %vm338_vm3, %v1442_v12  ;;  %v1083_v17 = vpop.permute.xlu0 %1082  ;;  %v1094_v23 = vsel %vm342_vm2, %v1087_v18, 0 }
  0xbb   : > { %1519 = vmatpush3.bf16.msra.mxu1 %v990_v15  ;;  %v1088_v19 = vsel %vm1086_vm9, %v1081_v16, %v1083_v17  ;;  %1520 = vmatprep.mubr.msk.bf16.mxu1 %vm1602_vm0, %v1600_v5 }
  0xbc   : > { %1451 = vmatprep.subr.msk.bf16.mxu0 %vm342_vm2, %v1088_v19  ;;  %v1085_v20 = vpop.permute.xlu1 %1084  ;;  %1524 = vmatprep.subr.bf16.mxu1 %v1600_v5 }
  0xbd   : > { %v1089_v21 = vsel %vm1086_vm9, %v1083_v17, %v1085_v20 }
  0xbe   : > { %v1189_v24 = vpop.permute.xlu0 %1188  ;;  %v1100_v25 = vsel %vm342_vm2, %v1089_v21, 0 }
  0xc0   : > { %1448 = vmatmul.mubr.msk.bf16.vlgmr.msra.gmra.mrb[24].mxu0 %vm338_vm3, %v1446_v22  ;;  %v1191_v26 = vpop.permute.xlu1 %1190 }
  0xc1   : > { %1103 = vmatpush1.bf16.msra.mxu0 %v1094_v23  ;;  %1134 = vmatprep.mubr.bf16.mxu0 %v1601_v6  ;;  %v1197_v28 = vsel %vm1196_vm10, %v1189_v24, %v1191_v26 }
  0xc2   : > { %1521 = vmatmul.mubr.msk.bf16.vlgmr.msra.gmra.mrb[24].mxu1 %vm338_vm3, %v1446_v22  ;;  %v1193_v27 = vpop.permute.xlu0 %1192  ;;  %v1204_v33 = vsel %vm342_vm2, %v1197_v28, 0 }
  0xc3   : > { %1525 = vmatpush3.bf16.msra.mxu1 %v1100_v25  ;;  %v1198_v29 = vsel %vm1196_vm10, %v1191_v26, %v1193_v27  ;;  %1526 = vmatprep.mubr.msk.bf16.mxu1 %vm1602_vm0, %v1600_v5 }
  0xc4   : > { %1455 = vmatprep.subr.msk.bf16.mxu0 %vm342_vm2, %v1198_v29  ;;  %v1195_v30 = vpop.permute.xlu1 %1194  ;;  %1530 = vmatprep.subr.bf16.mxu1 %v1600_v5 }
  0xc5   : > { %v1199_v31 = vsel %vm1196_vm10, %v1193_v27, %v1195_v30 }
  0xc6   : > { %v1210_v34 = vsel %vm342_vm2, %v1199_v31, 0 }
  0xc8   : > { %1452 = vmatmul.mubr.msk.bf16.vlgmr.msra.gmra.mrb[28].mxu0 %vm338_vm3, %v1450_v32 }
  0xc9   : > { %1213 = vmatpush1.bf16.msra.mxu0 %v1204_v33  ;;  %1244 = vmatprep.mubr.bf16.mxu0 %v1601_v6 }
  0xca   : > { %1527 = vmatmul.mubr.msk.bf16.vlgmr.msra.gmra.mrb[28].mxu1 %vm338_vm3, %v1450_v32 }
  0xcb   : > { %1531 = vmatpush3.bf16.msra.mxu1 %v1210_v34  ;;  %1532 = vmatprep.mubr.msk.bf16.mxu1 %vm1602_vm0, %v1600_v5 }
  0xd0   : > { %1456 = vmatmul.mubr.msk.bf16.vlgmr.msra.gmra.mrb[32].mxu0 %vm338_vm3, %v1454_v35 }
  0xd2   : > { %1533 = vmatmul.mubr.msk.bf16.vlgmr.msra.gmra.mrb[32].mxu1 %vm338_vm3, %v1454_v35 }
 0x163   : > { %v386_v36 = vpop.f32.mrb[0].mxu0 }
 0x164   : > { %v388_v37 = vpop.f32.mrb[1].mxu0 }
 0x165   : > { %v390_v38 = vpop.f32.mrb[2].mxu0  ;;  %v427_v39 = vpop.f32.mrb[0].mxu1 }
 0x166   : > { %v391_v40 = vpop.f32.mrb[3].mxu0  ;;  %v1486_v6 = vpop.f32.mrb[1].mxu1 }
 0x167   : > { %v430_v41 = vpop.f32.mrb[2].mxu1 }
 0x168   : > { %v1487_v42 = vpop.f32.mrb[3].mxu1 }
 0x16b   : > { %v479_v43 = vpop.f32.mrb[4].mxu0 }
 0x16c   : > { %v480_v44 = vadd.f32 %v479_v43, %v386_v36  ;;  %v481_v45 = vpop.f32.mrb[5].mxu0 }
 0x16d   : > { %v482_v5 = vadd.f32 %v481_v45, %v388_v37  ;;  %v483_v46 = vpop.f32.mrb[6].mxu0  ;;  %v520_v47 = vpop.f32.mrb[4].mxu1 }
 0x16e   : > { %v521_v48 = vadd.f32 %v520_v47, %v427_v39  ;;  %v484_v49 = vpop.f32.mrb[7].mxu0  ;;  %v1492_v50 = vpop.f32.mrb[5].mxu1 }
 0x16f   : > { %v523_v51 = vpop.f32.mrb[6].mxu1 }
 0x170   : > { %v1493_v52 = vpop.f32.mrb[7].mxu1 }
 0x173   : > { %v586_v53 = vpop.f32.mrb[8].mxu0 }
 0x174   : > { %v633_v54 = vadd.f32 %v586_v53, %v480_v44  ;;  %v588_v55 = vpop.f32.mrb[9].mxu0 }
 0x175   : > { %v634_v56 = vadd.f32 %v588_v55, %v482_v5  ;;  %v590_v57 = vpop.f32.mrb[10].mxu0  ;;  %v627_v58 = vpop.f32.mrb[8].mxu1 }
 0x176   : > { %v635_v59 = vadd.f32 %v627_v58, %v521_v48  ;;  %v591_v60 = vpop.f32.mrb[11].mxu0  ;;  %v1498_v61 = vpop.f32.mrb[9].mxu1 }
 0x177   : > { %v630_v62 = vpop.f32.mrb[10].mxu1 }
 0x178   : > { %v1499_v63 = vpop.f32.mrb[11].mxu1 }
 0x17b   : > { %v696_v0 = vpop.f32.mrb[12].mxu0 }
 0x17c   : > { %v743_v1 = vadd.f32 %v696_v0, %v633_v54  ;;  %v698_v2 = vpop.f32.mrb[13].mxu0 }
 0x17d   : > { %v744_v3 = vadd.f32 %v698_v2, %v634_v56  ;;  %v700_v4 = vpop.f32.mrb[14].mxu0  ;;  %v737_v7 = vpop.f32.mrb[12].mxu1 }
 0x17e   : > { %v745_v8 = vadd.f32 %v737_v7, %v635_v59  ;;  %v701_v9 = vpop.f32.mrb[15].mxu0  ;;  %v1504_v10 = vpop.f32.mrb[13].mxu1 }
 0x17f   : > { %v740_v11 = vpop.f32.mrb[14].mxu1  ;;  %v1300_v56 = vpop.permute.xlu0 %1299 }
 0x180   : > { %v1505_v12 = vpop.f32.mrb[15].mxu1 }
 0x183   : > { %v806_v13 = vpop.f32.mrb[16].mxu0 }
 0x184   : > { %v853_v14 = vadd.f32 %v806_v13, %v743_v1  ;;  %v808_v15 = vpop.f32.mrb[17].mxu0 }
 0x185   : > { %v854_v16 = vadd.f32 %v808_v15, %v744_v3  ;;  %v810_v17 = vpop.f32.mrb[18].mxu0  ;;  %v847_v18 = vpop.f32.mrb[16].mxu1 }
 0x186   : > { %v855_v19 = vadd.f32 %v847_v18, %v745_v8  ;;  %v811_v20 = vpop.f32.mrb[19].mxu0  ;;  %v1510_v21 = vpop.f32.mrb[17].mxu1 }
 0x187   : > { %v850_v22 = vpop.f32.mrb[18].mxu1 }
 0x188   : > { %v1511_v23 = vpop.f32.mrb[19].mxu1 }
 0x18b   : > { %v916_v24 = vpop.f32.mrb[20].mxu0 }
 0x18c   : > { %v963_v25 = vadd.f32 %v916_v24, %v853_v14  ;;  %v918_v26 = vpop.f32.mrb[21].mxu0 }
 0x18d   : > { %v964_v27 = vadd.f32 %v918_v26, %v854_v16  ;;  %v920_v28 = vpop.f32.mrb[22].mxu0  ;;  %v957_v29 = vpop.f32.mrb[20].mxu1 }
 0x18e   : > { %v965_v30 = vadd.f32 %v957_v29, %v855_v19  ;;  %v921_v31 = vpop.f32.mrb[23].mxu0  ;;  %v1516_v32 = vpop.f32.mrb[21].mxu1 }
 0x18f   : > { %v960_v33 = vpop.f32.mrb[22].mxu1 }
 0x190   : > { %v1517_v34 = vpop.f32.mrb[23].mxu1 }
 0x193   : > { %v1026_v35 = vpop.f32.mrb[24].mxu0 }
 0x194   : > { %v1073_v36 = vadd.f32 %v1026_v35, %v963_v25  ;;  %v1028_v37 = vpop.f32.mrb[25].mxu0 }
 0x195   : > { %v1074_v38 = vadd.f32 %v1028_v37, %v964_v27  ;;  %v1030_v39 = vpop.f32.mrb[26].mxu0  ;;  %v1067_v40 = vpop.f32.mrb[24].mxu1 }
 0x196   : > { %v1075_v6 = vadd.f32 %v1067_v40, %v965_v30  ;;  %v1031_v41 = vpop.f32.mrb[27].mxu0  ;;  %v1522_v42 = vpop.f32.mrb[25].mxu1 }
 0x197   : > { %v1070_v43 = vpop.f32.mrb[26].mxu1 }
 0x198   : > { %v1523_v44 = vpop.f32.mrb[27].mxu1 }
 0x19b   : > { %v1136_v45 = vpop.f32.mrb[28].mxu0 }
 0x19c   : > { %v1183_v5 = vadd.f32 %v1136_v45, %v1073_v36  ;;  %v1138_v46 = vpop.f32.mrb[29].mxu0 }
 0x19d   : > { %v1184_v47 = vadd.f32 %v1138_v46, %v1074_v38  ;;  %v1140_v48 = vpop.f32.mrb[30].mxu0  ;;  %v1177_v49 = vpop.f32.mrb[28].mxu1 }
 0x19e   : > { %v1185_v50 = vadd.f32 %v1177_v49, %v1075_v6  ;;  %v1141_v51 = vpop.f32.mrb[31].mxu0  ;;  %v1528_v52 = vpop.f32.mrb[29].mxu1 }
 0x19f   : > { %v1180_v53 = vpop.f32.mrb[30].mxu1 }
 0x1a0   : > { %v1529_v54 = vpop.f32.mrb[31].mxu1 }
 0x1a3   : > { %v1246_v55 = vpop.f32.mrb[32].mxu0 }
 0x1a4   : > { %v1293_v57 = vadd.f32 %v1246_v55, %v1183_v5  ;;  %v1248_v58 = vpop.f32.mrb[33].mxu0 }
 0x1a5   : > { %v1294_v59 = vadd.f32 %v1248_v58, %v1184_v47  ;;  %v1250_v60 = vpop.f32.mrb[34].mxu0  ;;  %v1287_v61 = vpop.f32.mrb[32].mxu1 }
 0x1a6   : > { %v1302_v62 = vadd.f32 %v1300_v56, %v1293_v57  ;;  %v1295_v63 = vadd.f32 %v1287_v61, %v1185_v50  ;;  %v1251_v0 = vpop.f32.mrb[35].mxu0  ;;  %v1534_v1 = vpop.f32.mrb[33].mxu1 }
 0x1a7   : > { %v1303_v2 = vadd.f32 %v1300_v56, %v1294_v59  ;;  %v1290_v3 = vpop.f32.mrb[34].mxu1 }
 0x1a8   : > { %1305 = vst [vmem:[%s300_s10] sm:$0xff] %v1302_v62  ;;  %v1304_v4 = vadd.f32 %v1300_v56, %v1295_v63  ;;  %v1535_v7 = vpop.f32.mrb[35].mxu1 }
 0x1a9   : > { %1306 = vst [vmem:[%s300_s10 + $0x8] sm:$0xff] %v1303_v2 }
 0x1aa   : > { %1307 = vst [vmem:[%s300_s10 + $0x10] sm:$0xff] %v1304_v4 }
 0x1ab PF: > { %s14_s17 = sadd.s32 1, %s1597_s17   ;;  %s1817_s15 = smov %s1593_s16 }
 0x1ac   : > { %p11_p5 = scmp.ge.s32.totalorder %s14_s17, 4   ;;  %s1818_s16 = smov %s1820_s18 }
 0x1ae   :  { %13 = sbr.rel (!%p11_p5) target bundleno = 2 (0x2), region = 77 }

// kernel: _masked_conv2d_forward.1
= control target key start
LH: loop header
LB: loop body
LE: loop exit
PB: predicated region body
PF: predicated region fallthrough
CT: control target
= control target key end

     0   :  { %s1636_s15 = smov 0   ;;  %s1638_s16 = smov 0   ;;  %s1812_s0 = inlined_call_operand.vmem [shape: bf16[2,4,512], index: 0, kind: input, shape index: {}, may-alias: {0,1}]   ;;  %s1813_s1 = inlined_call_operand.vmem [shape: bf16[2,4,512], index: 1, kind: input, shape index: {}, may-alias: {0,1}]   ;;  %s1814_s2 = inlined_call_operand.vmem [shape: bf16[9,8,4], index: 2, kind: input, shape index: {}]   ;;  %s1815_s3 = inlined_call_operand.vmem [shape: f32[8,1], index: 3, kind: input, shape index: {}]   ;;  %s1816_s4 = inlined_call_operand.vmem [shape: f32[2,8,384], index: 4, kind: output, shape index: {}]  }
   0x1   :  { %s1640_s17 = smov 0  }
   0x2 LB: > { %s26_s18 = sadd.s32 1, %s1593_s16  ;;  %p1417_p0 = scmp.ge.s32.totalorder %s1597_s17, 1  ;;  %s1597_s17 = sphi %s1640_s17, %s14_s17   ;;  %s1593_s16 = sphi %s1638_s16, %s1818_s16   ;;  %s1589_s15 = sphi %s1636_s15, %s1817_s15  }
   0x3   : > { %p28_p1 = scmp.ge.s32.totalorder %s26_s18, 2  ;;  %p214_p2 = scmp.lt.s32.totalorder %s1597_s17, 3 }
   0x5   : > { %s1820_s18 = smov (%p28_p1, %s26_s18), 0  ;;  %p215_p3 = pnand %p1417_p0, %p214_p2 }
   0x6   : > { %p267_p4 = scmp.lt.s32.totalorder (!%p215_p3), %s1589_s15, 1  ;;  %v310_v0 = vlaneseq (!%p215_p3)  ;;  %v1599_v1 = vmov (!%p215_p3), 1983009808   ;;  %v1600_v5 = vmov (!%p215_p3), 0.0   ;;  %v1601_v6 = vmov (!%p215_p3), 0   ;;  %s1603_s24 = smov (!%p215_p3), 127  }
   0x7   : > { %218 = sbr.rel (%p215_p3) target bundleno = 427 (0x1ab), region = 36  ;;  %v308_v2 = vunpack.c.l.s4 (!%p215_p3), %v1599_v1  ;;  %1482 = vmatprep.subr.bf16.mxu1 (!%p215_p3), %v1600_v5  ;;  %384 = vmatprep.mubr.bf16.mxu0 (!%p215_p3), %v1601_v6  ;;  %vm1602_vm0 = vmmov (!%p215_p3), 0   ;;  %s1604_s28 = smov (!%p215_p3), 126   ;;  %v1296_v14 = vld [vmem:[%s1815_s3] sm:$0xff] (!%p215_p3)  ;;  %vm334_vm1 = vcmask (!%p215_p3), 1039360   ;;  %vm342_vm2 = vcmask (!%p215_p3), 1041408  }
   0x8   : > { %v311_v3 = vshrl.u32 (!%p215_p3), %v310_v0, 7  ;;  %1573 = vset.pattern.permute.xlu0 (!%p215_p3), %v1601_v6  ;;  %1484 = vmatprep.mubr.msk.bf16.mxu1 (!%p215_p3), %vm1602_vm0, %v1600_v5  ;;  %s1605_s29 = smov (!%p215_p3), 110   ;;  %s1606_s30 = smov (!%p215_p3), 109   ;;  %v1423_v23 = vld [vmem:[%s1814_s2 + $0x4] sm:$0xf] (!%p215_p3)  ;;  %vm338_vm3 = vcmask (!%p215_p3), 31744  }
   0x9   : > { %v309_v4 = vunpack.c.0.s8 (!%p215_p3), %v308_v2  ;;  %s1607_s5 = smov (!%p215_p3), 108   ;;  %s1608_s6 = smov (!%p215_p3), 92   ;;  %vm536_vm4 = vcmask (!%p215_p3), 1031168   ;;  %v322_v34 = vld [vmem:[%s1814_s2] sm:$0xf] (!%p215_p3)  ;;  %vm646_vm5 = vcmask (!%p215_p3), 900096  }
   0xa   : > { %s1609_s7 = smov (!%p215_p3), 91   ;;  %s1610_s8 = smov (!%p215_p3), 90   ;;  %v1430_v44 = vld [vmem:[%s1814_s2 + $0x8] sm:$0xf] (!%p215_p3)  ;;  %vm756_vm6 = vcmask (!%p215_p3), 891904   ;;  %vm866_vm7 = vcmask (!%p215_p3), 883712  }
   0xb   : > { %v312_v7 = vsub.s32 (!%p215_p3), %v309_v4, %v311_v3  ;;  %v1434_v54 = vld [vmem:[%s1814_s2 + $0xc] sm:$0xf] (!%p215_p3)  ;;  %v1438_v0 = vld [vmem:[%s1814_s2 + $0x10] sm:$0xf] (!%p215_p3)  ;;  %vm976_vm8 = vcmask (!%p215_p3), 752640   ;;  %vm1086_vm9 = vcmask (!%p215_p3), 744448  }
   0xc   : > { %vm1196_vm10 = vcmask (!%p215_p3), 736256  }
   0xe   : > { %s1822_s15 = smov (!%p267_p4, %s1589_s15), 1 }
   0xf   : > { %s1460_s19 = sshll.u32 %s1822_s15, 3 }
  0x10   : > { %s274_s22 = scalar_lea.vmem %s1812_s0, %s1460_s19  ;;  %s1462_s23 = sadd.s32 6, %s1460_s19 }
  0x11   : > { %v303_v8 = vld [vmem:[%s274_s22] sm:$0x3f]  ;;  %s289_s27 = scalar_lea.vmem %s1813_s1, %s1462_s23 }
  0x12   : > { %v1665_v9 = vrot.slane %v303_v8, %v312_v7  ;;  %v306_v10 = vcombine.high %v303_v8, %v303_v8  ;;  %v304_v13 = vld [vmem:[%s289_s27] sm:$0x3] }
  0x14   : > { %326 = vrot.lane.b32.xlu0 %v1665_v9, %s1603_s24  ;;  %v1668_v11 = vrot.slane %v306_v10, %v312_v7  ;;  %v321_v12 = vcombine.high %v1665_v9, %v1665_v9  ;;  %v437_v26 = vsel %vm342_vm2, %v1665_v9, 0 }
  0x16   : > { %330 = vrot.lane.b32.xlu1 %v1668_v11, %s1603_s24  ;;  %v443_v28 = vsel %vm342_vm2, %v1668_v11, 0 }
  0x18   : > { %328 = vrot.lane.b32.xlu0 %v321_v12, %s1603_s24 }
  0x1a   : > { %332 = vrot.lane.b32.xlu1 %v304_v13, %s1603_s24 }
  0x1c   : > { %528 = vrot.lane.b32.xlu0 %v1665_v9, %s1604_s28 }
  0x1e   : > { %530 = vrot.lane.b32.xlu1 %v321_v12, %s1604_s28 }
  0x20   : > { %532 = vrot.lane.b32.xlu0 %v1668_v11, %s1604_s28 }
  0x22   : > { %534 = vrot.lane.b32.xlu1 %v304_v13, %s1604_s28 }
  0x24   : > { %638 = vrot.lane.b32.xlu0 %v1665_v9, %s1605_s29 }
  0x26   : > { %640 = vrot.lane.b32.xlu1 %v321_v12, %s1605_s29 }
  0x28   : > { %642 = vrot.lane.b32.xlu0 %v1668_v11, %s1605_s29 }
  0x2a   : > { %644 = vrot.lane.b32.xlu1 %v304_v13, %s1605_s29 }
  0x2c   : > { %748 = vrot.lane.b32.xlu0 %v1665_v9, %s1606_s30 }
  0x2e   : > { %750 = vrot.lane.b32.xlu1 %v321_v12, %s1606_s30 }
  0x30   : > { %752 = vrot.lane.b32.xlu0 %v1668_v11, %s1606_s30 }
  0x32   : > { %754 = vrot.lane.b32.xlu1 %v304_v13, %s1606_s30 }
  0x34   : > { %858 = vrot.lane.b32.xlu0 %v1665_v9, %s1607_s5 }
  0x36   : > { %860 = vrot.lane.b32.xlu1 %v321_v12, %s1607_s5 }
  0x38   : > { %862 = vrot.lane.b32.xlu0 %v1668_v11, %s1607_s5 }
  0x3a   : > { %864 = vrot.lane.b32.xlu1 %v304_v13, %s1607_s5 }
  0x3c   : > { %968 = vrot.lane.b32.xlu0 %v1665_v9, %s1608_s6 }
  0x3e   : > { %970 = vrot.lane.b32.xlu1 %v321_v12, %s1608_s6 }
  0x40   : > { %972 = vrot.lane.b32.xlu0 %v1668_v11, %s1608_s6 }
  0x42   : > { %974 = vrot.lane.b32.xlu1 %v304_v13, %s1608_s6 }
  0x44   : > { %1078 = vrot.lane.b32.xlu0 %v1665_v9, %s1609_s7 }
  0x46   : > { %1080 = vrot.lane.b32.xlu1 %v321_v12, %s1609_s7 }
  0x48   : > { %1082 = vrot.lane.b32.xlu0 %v1668_v11, %s1609_s7 }
  0x4a   : > { %1084 = vrot.lane.b32.xlu1 %v304_v13, %s1609_s7  ;;  %s1536_s7 = smul.u32 24, %s1822_s15 }
  0x4c   : > { %1188 = vrot.lane.b32.xlu0 %v1665_v9, %s1610_s8  ;;  %s300_s10 = scalar_lea.vmem %s1816_s4, %s1536_s7 }
  0x4e   : > { %1190 = vrot.lane.b32.xlu1 %v321_v12, %s1610_s8 }
  0x50   : > { %1192 = vrot.lane.b32.xlu0 %v1668_v11, %s1610_s8 }
  0x52   : > { %1194 = vrot.lane.b32.xlu1 %v304_v13, %s1610_s8 }
  0x54   : > { %1299 = vperm.xlu0 %1573, %v1296_v14  }
  0x86   : > { %v327_v15 = vpop.permute.xlu0 %326 }
  0x88   : > { %v331_v16 = vpop.permute.xlu1 %330 }
  0x8a   : > { %v329_v17 = vpop.permute.xlu0 %328 }
  0x8b   : > { %v336_v18 = vsel %vm334_vm1, %v329_v17, %v331_v16  ;;  %v335_v19 = vsel %vm334_vm1, %v327_v15, %v329_v17 }
  0x8c   : > { %1424 = vmatprep.subr.msk.bf16.mxu0 %vm342_vm2, %v336_v18  ;;  %v333_v20 = vpop.permute.xlu1 %332  ;;  %v344_v21 = vsel %vm342_vm2, %v335_v19, 0 }
  0x8d   : > { %353 = vmatpush1.bf16.msra.mxu0 %v344_v21  ;;  %v337_v22 = vsel %vm334_vm1, %v331_v16, %v333_v20 }
  0x8e   : > { %v350_v24 = vsel %vm342_vm2, %v337_v22, 0  ;;  %v529_v25 = vpop.permute.xlu0 %528  ;;  %1427 = vmatprep.subr.msk.bf16.mxu0 %vm342_vm2, %v321_v12  ;;  %v1442_v12 = vld [vmem:[%s1814_s2 + $0x14] sm:$0xf]  ;;  %v1446_v22 = vld [vmem:[%s1814_s2 + $0x18] sm:$0xf] }
  0x8f   : > { %1483 = vmatpush3.bf16.msra.mxu1 %v350_v24 }
  0x90   : > { %1425 = vmatmul.mubr.msk.bf16.vlgmr.msra.gmra.mrb[0].mxu0 %vm338_vm3, %v1423_v23  ;;  %1488 = vmatprep.subr.bf16.mxu1 %v1600_v5  ;;  %v531_v27 = vpop.permute.xlu1 %530 }
  0x91   : > { %446 = vmatpush1.bf16.msra.mxu0 %v437_v26  ;;  %477 = vmatprep.mubr.bf16.mxu0 %v1601_v6  ;;  %v537_v30 = vsel %vm536_vm4, %v529_v25, %v531_v27 }
  0x92   : > { %1485 = vmatmul.mubr.msk.bf16.vlgmr.msra.gmra.mrb[0].mxu1 %vm338_vm3, %v1423_v23  ;;  %v533_v29 = vpop.permute.xlu0 %532  ;;  %v544_v35 = vsel %vm342_vm2, %v537_v30, 0 }
  0x93   : > { %1489 = vmatpush3.bf16.msra.mxu1 %v443_v28  ;;  %v538_v31 = vsel %vm536_vm4, %v531_v27, %v533_v29  ;;  %1490 = vmatprep.mubr.msk.bf16.mxu1 %vm1602_vm0, %v1600_v5 }
  0x94   : > { %1431 = vmatprep.subr.msk.bf16.mxu0 %vm342_vm2, %v538_v31  ;;  %v535_v32 = vpop.permute.xlu1 %534  ;;  %1494 = vmatprep.subr.bf16.mxu1 %v1600_v5 }
  0x95   : > { %v539_v33 = vsel %vm536_vm4, %v533_v29, %v535_v32  ;;  %v1450_v32 = vld [vmem:[%s1814_s2 + $0x1c] sm:$0xf] }
  0x96   : > { %v639_v36 = vpop.permute.xlu0 %638  ;;  %v550_v37 = vsel %vm342_vm2, %v539_v33, 0 }
  0x98   : > { %1428 = vmatmul.mubr.msk.bf16.vlgmr.msra.gmra.mrb[4].mxu0 %vm338_vm3, %v322_v34  ;;  %v641_v38 = vpop.permute.xlu1 %640 }
  0x99   : > { %553 = vmatpush1.bf16.msra.mxu0 %v544_v35  ;;  %584 = vmatprep.mubr.bf16.mxu0 %v1601_v6  ;;  %v647_v40 = vsel %vm646_vm5, %v639_v36, %v641_v38  ;;  %v1454_v35 = vld [vmem:[%s1814_s2 + $0x20] sm:$0xf] }
  0x9a   : > { %1491 = vmatmul.mubr.msk.bf16.vlgmr.msra.gmra.mrb[4].mxu1 %vm338_vm3, %v322_v34  ;;  %v643_v39 = vpop.permute.xlu0 %642  ;;  %v654_v45 = vsel %vm342_vm2, %v647_v40, 0 }
  0x9b   : > { %1495 = vmatpush3.bf16.msra.mxu1 %v550_v37  ;;  %v648_v41 = vsel %vm646_vm5, %v641_v38, %v643_v39  ;;  %1496 = vmatprep.mubr.msk.bf16.mxu1 %vm1602_vm0, %v1600_v5 }
  0x9c   : > { %1435 = vmatprep.subr.msk.bf16.mxu0 %vm342_vm2, %v648_v41  ;;  %v645_v42 = vpop.permute.xlu1 %644  ;;  %1500 = vmatprep.subr.bf16.mxu1 %v1600_v5 }
  0x9d   : > { %v649_v43 = vsel %vm646_vm5, %v643_v39, %v645_v42 }
  0x9e   : > { %v749_v46 = vpop.permute.xlu0 %748  ;;  %v660_v47 = vsel %vm342_vm2, %v649_v43, 0 }
  0xa0   : > { %1432 = vmatmul.mubr.msk.bf16.vlgmr.msra.gmra.mrb[8].mxu0 %vm338_vm3, %v1430_v44  ;;  %v751_v48 = vpop.permute.xlu1 %750 }
  0xa1   : > { %663 = vmatpush1.bf16.msra.mxu0 %v654_v45  ;;  %694 = vmatprep.mubr.bf16.mxu0 %v1601_v6  ;;  %v757_v50 = vsel %vm756_vm6, %v749_v46, %v751_v48 }
  0xa2   : > { %1497 = vmatmul.mubr.msk.bf16.vlgmr.msra.gmra.mrb[8].mxu1 %vm338_vm3, %v1430_v44  ;;  %v753_v49 = vpop.permute.xlu0 %752  ;;  %v764_v55 = vsel %vm342_vm2, %v757_v50, 0 }
  0xa3   : > { %1501 = vmatpush3.bf16.msra.mxu1 %v660_v47  ;;  %v758_v51 = vsel %vm756_vm6, %v751_v48, %v753_v49  ;;  %1502 = vmatprep.mubr.msk.bf16.mxu1 %vm1602_vm0, %v1600_v5 }
  0xa4   : > { %1439 = vmatprep.subr.msk.bf16.mxu0 %vm342_vm2, %v758_v51  ;;  %v755_v52 = vpop.permute.xlu1 %754  ;;  %1506 = vmatprep.subr.bf16.mxu1 %v1600_v5 }
  0xa5   : > { %v759_v53 = vsel %vm756_vm6, %v753_v49, %v755_v52 }
  0xa6   : > { %v859_v56 = vpop.permute.xlu0 %858  ;;  %v770_v57 = vsel %vm342_vm2, %v759_v53, 0 }
  0xa8   : > { %1436 = vmatmul.mubr.msk.bf16.vlgmr.msra.gmra.mrb[12].mxu0 %vm338_vm3, %v1434_v54  ;;  %v861_v58 = vpop.permute.xlu1 %860 }
  0xa9   : > { %773 = vmatpush1.bf16.msra.mxu0 %v764_v55  ;;  %804 = vmatprep.mubr.bf16.mxu0 %v1601_v6  ;;  %v867_v60 = vsel %vm866_vm7, %v859_v56, %v861_v58 }
  0xaa   : > { %1503 = vmatmul.mubr.msk.bf16.vlgmr.msra.gmra.mrb[12].mxu1 %vm338_vm3, %v1434_v54  ;;  %v863_v59 = vpop.permute.xlu0 %862  ;;  %v874_v1 = vsel %vm342_vm2, %v867_v60, 0 }
  0xab   : > { %1507 = vmatpush3.bf16.msra.mxu1 %v770_v57  ;;  %v868_v61 = vsel %vm866_vm7, %v861_v58, %v863_v59  ;;  %1508 = vmatprep.mubr.msk.bf16.mxu1 %vm1602_vm0, %v1600_v5 }
  0xac   : > { %1443 = vmatprep.subr.msk.bf16.mxu0 %vm342_vm2, %v868_v61  ;;  %v865_v62 = vpop.permute.xlu1 %864  ;;  %1512 = vmatprep.subr.bf16.mxu1 %v1600_v5 }
  0xad   : > { %v869_v63 = vsel %vm866_vm7, %v863_v59, %v865_v62 }
  0xae   : > { %v969_v2 = vpop.permute.xlu0 %968  ;;  %v880_v3 = vsel %vm342_vm2, %v869_v63, 0 }
  0xb0   : > { %1440 = vmatmul.mubr.msk.bf16.vlgmr.msra.gmra.mrb[16].mxu0 %vm338_vm3, %v1438_v0  ;;  %v971_v4 = vpop.permute.xlu1 %970 }
  0xb1   : > { %883 = vmatpush1.bf16.msra.mxu0 %v874_v1  ;;  %914 = vmatprep.mubr.bf16.mxu0 %v1601_v6  ;;  %v977_v8 = vsel %vm976_vm8, %v969_v2, %v971_v4 }
  0xb2   : > { %1509 = vmatmul.mubr.msk.bf16.vlgmr.msra.gmra.mrb[16].mxu1 %vm338_vm3, %v1438_v0  ;;  %v973_v7 = vpop.permute.xlu0 %972  ;;  %v984_v13 = vsel %vm342_vm2, %v977_v8, 0 }
  0xb3   : > { %1513 = vmatpush3.bf16.msra.mxu1 %v880_v3  ;;  %v978_v9 = vsel %vm976_vm8, %v971_v4, %v973_v7  ;;  %1514 = vmatprep.mubr.msk.bf16.mxu1 %vm1602_vm0, %v1600_v5 }
  0xb4   : > { %1447 = vmatprep.subr.msk.bf16.mxu0 %vm342_vm2, %v978_v9  ;;  %v975_v10 = vpop.permute.xlu1 %974  ;;  %1518 = vmatprep.subr.bf16.mxu1 %v1600_v5 }
  0xb5   : > { %v979_v11 = vsel %vm976_vm8, %v973_v7, %v975_v10 }
  0xb6   : > { %v1079_v14 = vpop.permute.xlu0 %1078  ;;  %v990_v15 = vsel %vm342_vm2, %v979_v11, 0 }
  0xb8   : > { %1444 = vmatmul.mubr.msk.bf16.vlgmr.msra.gmra.mrb[20].mxu0 %vm338_vm3, %v1442_v12  ;;  %v1081_v16 = vpop.permute.xlu1 %1080 }
  0xb9   : > { %993 = vmatpush1.bf16.msra.mxu0 %v984_v13  ;;  %1024 = vmatprep.mubr.bf16.mxu0 %v1601_v6  ;;  %v1087_v18 = vsel %vm1086_vm9, %v1079_v14, %v1081_v16 }
  0xba   : > { %1515 = vmatmul.mubr.msk.bf16.vlgmr.msra.gmra.mrb[20].mxu1 %vm338_vm3, %v1442_v12  ;;  %v1083_v17 = vpop.permute.xlu0 %1082  ;;  %v1094_v23 = vsel %vm342_vm2, %v1087_v18, 0 }
  0xbb   : > { %1519 = vmatpush3.bf16.msra.mxu1 %v990_v15  ;;  %v1088_v19 = vsel %vm1086_vm9, %v1081_v16, %v1083_v17  ;;  %1520 = vmatprep.mubr.msk.bf16.mxu1 %vm1602_vm0, %v1600_v5 }
  0xbc   : > { %1451 = vmatprep.subr.msk.bf16.mxu0 %vm342_vm2, %v1088_v19  ;;  %v1085_v20 = vpop.permute.xlu1 %1084  ;;  %1524 = vmatprep.subr.bf16.mxu1 %v1600_v5 }
  0xbd   : > { %v1089_v21 = vsel %vm1086_vm9, %v1083_v17, %v1085_v20 }
  0xbe   : > { %v1189_v24 = vpop.permute.xlu0 %1188  ;;  %v1100_v25 = vsel %vm342_vm2, %v1089_v21, 0 }
  0xc0   : > { %1448 = vmatmul.mubr.msk.bf16.vlgmr.msra.gmra.mrb[24].mxu0 %vm338_vm3, %v1446_v22  ;;  %v1191_v26 = vpop.permute.xlu1 %1190 }
  0xc1   : > { %1103 = vmatpush1.bf16.msra.mxu0 %v1094_v23  ;;  %1134 = vmatprep.mubr.bf16.mxu0 %v1601_v6  ;;  %v1197_v28 = vsel %vm1196_vm10, %v1189_v24, %v1191_v26 }
  0xc2   : > { %1521 = vmatmul.mubr.msk.bf16.vlgmr.msra.gmra.mrb[24].mxu1 %vm338_vm3, %v1446_v22  ;;  %v1193_v27 = vpop.permute.xlu0 %1192  ;;  %v1204_v33 = vsel %vm342_vm2, %v1197_v28, 0 }
  0xc3   : > { %1525 = vmatpush3.bf16.msra.mxu1 %v1100_v25  ;;  %v1198_v29 = vsel %vm1196_vm10, %v1191_v26, %v1193_v27  ;;  %1526 = vmatprep.mubr.msk.bf16.mxu1 %vm1602_vm0, %v1600_v5 }
  0xc4   : > { %1455 = vmatprep.subr.msk.bf16.mxu0 %vm342_vm2, %v1198_v29  ;;  %v1195_v30 = vpop.permute.xlu1 %1194  ;;  %1530 = vmatprep.subr.bf16.mxu1 %v1600_v5 }
  0xc5   : > { %v1199_v31 = vsel %vm1196_vm10, %v1193_v27, %v1195_v30 }
  0xc6   : > { %v1210_v34 = vsel %vm342_vm2, %v1199_v31, 0 }
  0xc8   : > { %1452 = vmatmul.mubr.msk.bf16.vlgmr.msra.gmra.mrb[28].mxu0 %vm338_vm3, %v1450_v32 }
  0xc9   : > { %1213 = vmatpush1.bf16.msra.mxu0 %v1204_v33  ;;  %1244 = vmatprep.mubr.bf16.mxu0 %v1601_v6 }
  0xca   : > { %1527 = vmatmul.mubr.msk.bf16.vlgmr.msra.gmra.mrb[28].mxu1 %vm338_vm3, %v1450_v32 }
  0xcb   : > { %1531 = vmatpush3.bf16.msra.mxu1 %v1210_v34  ;;  %1532 = vmatprep.mubr.msk.bf16.mxu1 %vm1602_vm0, %v1600_v5 }
  0xd0   : > { %1456 = vmatmul.mubr.msk.bf16.vlgmr.msra.gmra.mrb[32].mxu0 %vm338_vm3, %v1454_v35 }
  0xd2   : > { %1533 = vmatmul.mubr.msk.bf16.vlgmr.msra.gmra.mrb[32].mxu1 %vm338_vm3, %v1454_v35 }
 0x163   : > { %v386_v36 = vpop.f32.mrb[0].mxu0 }
 0x164   : > { %v388_v37 = vpop.f32.mrb[1].mxu0 }
 0x165   : > { %v390_v38 = vpop.f32.mrb[2].mxu0  ;;  %v427_v39 = vpop.f32.mrb[0].mxu1 }
 0x166   : > { %v391_v40 = vpop.f32.mrb[3].mxu0  ;;  %v1486_v6 = vpop.f32.mrb[1].mxu1 }
 0x167   : > { %v430_v41 = vpop.f32.mrb[2].mxu1 }
 0x168   : > { %v1487_v42 = vpop.f32.mrb[3].mxu1 }
 0x16b   : > { %v479_v43 = vpop.f32.mrb[4].mxu0 }
 0x16c   : > { %v480_v44 = vadd.f32 %v479_v43, %v386_v36  ;;  %v481_v45 = vpop.f32.mrb[5].mxu0 }
 0x16d   : > { %v482_v5 = vadd.f32 %v481_v45, %v388_v37  ;;  %v483_v46 = vpop.f32.mrb[6].mxu0  ;;  %v520_v47 = vpop.f32.mrb[4].mxu1 }
 0x16e   : > { %v521_v48 = vadd.f32 %v520_v47, %v427_v39  ;;  %v484_v49 = vpop.f32.mrb[7].mxu0  ;;  %v1492_v50 = vpop.f32.mrb[5].mxu1 }
 0x16f   : > { %v523_v51 = vpop.f32.mrb[6].mxu1 }
 0x170   : > { %v1493_v52 = vpop.f32.mrb[7].mxu1 }
 0x173   : > { %v586_v53 = vpop.f32.mrb[8].mxu0 }
 0x174   : > { %v633_v54 = vadd.f32 %v586_v53, %v480_v44  ;;  %v588_v55 = vpop.f32.mrb[9].mxu0 }
 0x175   : > { %v634_v56 = vadd.f32 %v588_v55, %v482_v5  ;;  %v590_v57 = vpop.f32.mrb[10].mxu0  ;;  %v627_v58 = vpop.f32.mrb[8].mxu1 }
 0x176   : > { %v635_v59 = vadd.f32 %v627_v58, %v521_v48  ;;  %v591_v60 = vpop.f32.mrb[11].mxu0  ;;  %v1498_v61 = vpop.f32.mrb[9].mxu1 }
 0x177   : > { %v630_v62 = vpop.f32.mrb[10].mxu1 }
 0x178   : > { %v1499_v63 = vpop.f32.mrb[11].mxu1 }
 0x17b   : > { %v696_v0 = vpop.f32.mrb[12].mxu0 }
 0x17c   : > { %v743_v1 = vadd.f32 %v696_v0, %v633_v54  ;;  %v698_v2 = vpop.f32.mrb[13].mxu0 }
 0x17d   : > { %v744_v3 = vadd.f32 %v698_v2, %v634_v56  ;;  %v700_v4 = vpop.f32.mrb[14].mxu0  ;;  %v737_v7 = vpop.f32.mrb[12].mxu1 }
 0x17e   : > { %v745_v8 = vadd.f32 %v737_v7, %v635_v59  ;;  %v701_v9 = vpop.f32.mrb[15].mxu0  ;;  %v1504_v10 = vpop.f32.mrb[13].mxu1 }
 0x17f   : > { %v740_v11 = vpop.f32.mrb[14].mxu1  ;;  %v1300_v56 = vpop.permute.xlu0 %1299 }
 0x180   : > { %v1505_v12 = vpop.f32.mrb[15].mxu1 }
 0x183   : > { %v806_v13 = vpop.f32.mrb[16].mxu0 }
 0x184   : > { %v853_v14 = vadd.f32 %v806_v13, %v743_v1  ;;  %v808_v15 = vpop.f32.mrb[17].mxu0 }
 0x185   : > { %v854_v16 = vadd.f32 %v808_v15, %v744_v3  ;;  %v810_v17 = vpop.f32.mrb[18].mxu0  ;;  %v847_v18 = vpop.f32.mrb[16].mxu1 }
 0x186   : > { %v855_v19 = vadd.f32 %v847_v18, %v745_v8  ;;  %v811_v20 = vpop.f32.mrb[19].mxu0  ;;  %v1510_v21 = vpop.f32.mrb[17].mxu1 }
 0x187   : > { %v850_v22 = vpop.f32.mrb[18].mxu1 }
 0x188   : > { %v1511_v23 = vpop.f32.mrb[19].mxu1 }
 0x18b   : > { %v916_v24 = vpop.f32.mrb[20].mxu0 }
 0x18c   : > { %v963_v25 = vadd.f32 %v916_v24, %v853_v14  ;;  %v918_v26 = vpop.f32.mrb[21].mxu0 }
 0x18d   : > { %v964_v27 = vadd.f32 %v918_v26, %v854_v16  ;;  %v920_v28 = vpop.f32.mrb[22].mxu0  ;;  %v957_v29 = vpop.f32.mrb[20].mxu1 }
 0x18e   : > { %v965_v30 = vadd.f32 %v957_v29, %v855_v19  ;;  %v921_v31 = vpop.f32.mrb[23].mxu0  ;;  %v1516_v32 = vpop.f32.mrb[21].mxu1 }
 0x18f   : > { %v960_v33 = vpop.f32.mrb[22].mxu1 }
 0x190   : > { %v1517_v34 = vpop.f32.mrb[23].mxu1 }
 0x193   : > { %v1026_v35 = vpop.f32.mrb[24].mxu0 }
 0x194   : > { %v1073_v36 = vadd.f32 %v1026_v35, %v963_v25  ;;  %v1028_v37 = vpop.f32.mrb[25].mxu0 }
 0x195   : > { %v1074_v38 = vadd.f32 %v1028_v37, %v964_v27  ;;  %v1030_v39 = vpop.f32.mrb[26].mxu0  ;;  %v1067_v40 = vpop.f32.mrb[24].mxu1 }
 0x196   : > { %v1075_v6 = vadd.f32 %v1067_v40, %v965_v30  ;;  %v1031_v41 = vpop.f32.mrb[27].mxu0  ;;  %v1522_v42 = vpop.f32.mrb[25].mxu1 }
 0x197   : > { %v1070_v43 = vpop.f32.mrb[26].mxu1 }
 0x198   : > { %v1523_v44 = vpop.f32.mrb[27].mxu1 }
 0x19b   : > { %v1136_v45 = vpop.f32.mrb[28].mxu0 }
 0x19c   : > { %v1183_v5 = vadd.f32 %v1136_v45, %v1073_v36  ;;  %v1138_v46 = vpop.f32.mrb[29].mxu0 }
 0x19d   : > { %v1184_v47 = vadd.f32 %v1138_v46, %v1074_v38  ;;  %v1140_v48 = vpop.f32.mrb[30].mxu0  ;;  %v1177_v49 = vpop.f32.mrb[28].mxu1 }
 0x19e   : > { %v1185_v50 = vadd.f32 %v1177_v49, %v1075_v6  ;;  %v1141_v51 = vpop.f32.mrb[31].mxu0  ;;  %v1528_v52 = vpop.f32.mrb[29].mxu1 }
 0x19f   : > { %v1180_v53 = vpop.f32.mrb[30].mxu1 }
 0x1a0   : > { %v1529_v54 = vpop.f32.mrb[31].mxu1 }
 0x1a3   : > { %v1246_v55 = vpop.f32.mrb[32].mxu0 }
 0x1a4   : > { %v1293_v57 = vadd.f32 %v1246_v55, %v1183_v5  ;;  %v1248_v58 = vpop.f32.mrb[33].mxu0 }
 0x1a5   : > { %v1294_v59 = vadd.f32 %v1248_v58, %v1184_v47  ;;  %v1250_v60 = vpop.f32.mrb[34].mxu0  ;;  %v1287_v61 = vpop.f32.mrb[32].mxu1 }
 0x1a6   : > { %v1302_v62 = vadd.f32 %v1300_v56, %v1293_v57  ;;  %v1295_v63 = vadd.f32 %v1287_v61, %v1185_v50  ;;  %v1251_v0 = vpop.f32.mrb[35].mxu0  ;;  %v1534_v1 = vpop.f32.mrb[33].mxu1 }
 0x1a7   : > { %v1303_v2 = vadd.f32 %v1300_v56, %v1294_v59  ;;  %v1290_v3 = vpop.f32.mrb[34].mxu1 }
 0x1a8   : > { %1305 = vst [vmem:[%s300_s10] sm:$0xff] %v1302_v62  ;;  %v1304_v4 = vadd.f32 %v1300_v56, %v1295_v63  ;;  %v1535_v7 = vpop.f32.mrb[35].mxu1 }
 0x1a9   : > { %1306 = vst [vmem:[%s300_s10 + $0x8] sm:$0xff] %v1303_v2 }
 0x1aa   : > { %1307 = vst [vmem:[%s300_s10 + $0x10] sm:$0xff] %v1304_v4 }
 0x1ab PF: > { %s14_s17 = sadd.s32 1, %s1597_s17   ;;  %s1817_s15 = smov %s1593_s16 }
 0x1ac   : > { %p11_p5 = scmp.ge.s32.totalorder %s14_s17, 4   ;;  %s1818_s16 = smov %s1820_s18 }
 0x1ae   :  { %13 = sbr.rel (!%p11_p5) target bundleno = 2 (0x2), region = 77 }

</bundles_post_ra>
